<compile_context>
chip_gen: v6e
topology: v6e:2x2x1
jax: 0.10.0
libtpu: 0.0.40
codegen_flags: <defaults>
</compile_context>

<pallas_src>
import jax
import jax.numpy as jnp
from jax.experimental import pallas as pl
from jax.experimental.pallas import tpu as pltpu

F_MAPS = 40     # conv feature maps
K_TIME = 25     # temporal conv kernel width
POOL_W = 51     # avg-pool window
POOL_S = 5      # avg-pool stride
BN_EPS = 1e-5


def _shallownet_kernel(p_ref, wc_ref, bct_ref, wz_ref, mask_ref, cs_ref, rs_ref,
                       bout_ref, o_ref):
    """One batch tile (Bt samples) per grid step.

    p_ref:    (Bt, C*25, T1)      bf16 im2col patches
    wc_ref:   (40, C*25)          bf16 fused Conv1+Conv2 (+BN scale) weight
    bct_ref:  (Bt*40, 1)          f32  fused conv+BN bias, tiled over the batch tile
    wz_ref:   (T1, 40*out_dim)    bf16 fused AvgPool+Linear weight
    mask_ref: (Bt*40, 40*out_dim) bf16 0/1 mask keeping only matching feature maps
    cs_ref:   (40*out_dim, OUTP)  f32  0/1 column-sum selector (sums over f)
    rs_ref:   (Bt, Bt*40)         f32  0/1 row-group-sum selector (sums per-sample rows)
    bout_ref: (1, OUTP)           f32  Linear bias, lane-padded
    o_ref:    (Bt, OUTP)          f32  output block
    """
    Bt = p_ref.shape[0]
    wc = wc_ref[...]

    # Fused conv stack: one (40, C*25) @ (C*25, T1) MXU matmul per sample,
    # results stacked along the sublane axis -> (Bt*40, T1).
    hs = [jnp.dot(wc, p_ref[b], preferred_element_type=jnp.float32)
          for b in range(Bt)]
    h = jnp.concatenate(hs, axis=0)
    h = h + bct_ref[...]                                               # conv + BN bias
    h = jnp.where(h > 0, h, jnp.exp(jnp.minimum(h, 0.0)) - 1.0)        # ELU(alpha=1)

    # Fused AvgPool + flatten + Linear:
    #   z[(b,f'), f*O+o] = sum_t helu[(b,f'), t] * Wz[t, f*O+o]
    #                    = <pooled(b, f'), wout(o, f*Tp: (f+1)*Tp)>
    z = jnp.dot(h.astype(jnp.bfloat16), wz_ref[...],
                preferred_element_type=jnp.float32)                    # (Bt*40, 40*O)
    z = z * mask_ref[...]                                              # keep f == f'
    out = jnp.dot(rs_ref[...], z, preferred_element_type=jnp.float32)  # (Bt, 40*O)
    out = jnp.dot(out, cs_ref[...], preferred_element_type=jnp.float32)  # (Bt, OUTP)
    o_ref[...] = out + bout_ref[...]


def shallownet_forward(x, params, batch_tile=8):
    """x: (B, 1, C, T) float32, NCHW as in PyTorch. Returns (B, out_dim)."""
    B, one, C, T = x.shape
    assert one == 1
    T1 = T - K_TIME + 1
    Tp = (T1 - POOL_W) // POOL_S + 1
    out_dim = params["wout"].shape[0]
    assert params["wout"].shape[1] == F_MAPS * Tp  # holds for T == 200

    Bt = max(1, min(batch_tile, B))
    Bp = ((B + Bt - 1) // Bt) * Bt
    OUTP = ((out_dim + 127) // 128) * 128
    CK = C * K_TIME

    # ---- parameter folding (plain-JAX glue) ----
    w1 = params["w1"][:, 0, 0, :].astype(jnp.float32)            # (40, 25)   [f_in, k]
    w2 = params["w2"][:, :, :, 0].astype(jnp.float32)            # (40, 40, C)[f_out, f_in, c]
    inv_std = 1.0 / jnp.sqrt(params["bn_var"] + BN_EPS)
    bn_scale = params["bn_gamma"] * inv_std                      # (40,)
    bn_shift = params["bn_beta"] - params["bn_mean"] * bn_scale  # (40,)

    wc_raw = jnp.einsum('oic,ik->ock', w2, w1)                   # (40, C, 25)
    wc = (wc_raw * bn_scale[:, None, None]).reshape(F_MAPS, CK).astype(jnp.bfloat16)
    bc = bn_scale * (params["b2"] + jnp.einsum('oic,i->o', w2, params["b1"])) + bn_shift
    bct = jnp.tile(bc.reshape(F_MAPS, 1), (Bt, 1)).astype(jnp.float32)   # (Bt*40, 1)

    # AvgPool matrix P[t, p] = 1/51 if POOL_S*p <= t < POOL_S*p + POOL_W, folded
    # with the (f-major flattened) Linear weight: Wz[t, f*O+o] = sum_p P[t,p]*wout[o, f*Tp+p]
    t_idx = jnp.arange(T1)[:, None]
    p_idx = jnp.arange(Tp)[None, :]
    pool = jnp.where((t_idx >= POOL_S * p_idx) & (t_idx < POOL_S * p_idx + POOL_W),
                     1.0 / POOL_W, 0.0).astype(jnp.float32)              # (T1, Tp)
    wr = jnp.transpose(params["wout"].reshape(out_dim, F_MAPS, Tp), (1, 2, 0))  # (40, Tp, O)
    wz = jnp.einsum('tp,fpo->tfo', pool, wr).reshape(T1, F_MAPS * out_dim)
    wz = wz.astype(jnp.bfloat16)

    # 0/1 selectors for the mask-matmul epilogue.
    row_f = jnp.arange(Bt * F_MAPS) % F_MAPS
    col_f = jnp.arange(F_MAPS * out_dim) // out_dim
    mask = (row_f[:, None] == col_f[None, :]).astype(jnp.bfloat16)       # (Bt*40, 40*O)
    cs = jnp.tile(jnp.eye(out_dim, OUTP, dtype=jnp.float32), (F_MAPS, 1))  # (40*O, OUTP)
    rs = jnp.repeat(jnp.eye(Bt, dtype=jnp.float32), F_MAPS, axis=1)      # (Bt, Bt*40)
    bout = jnp.zeros((1, OUTP), jnp.float32).at[0, :out_dim].set(params["bout"])

    # im2col patches: P[b, c*25+k, t] = x[b, c, t+k].
    xs = x[:, 0].astype(jnp.float32)
    xs = jnp.pad(xs, ((0, Bp - B), (0, 0), (0, 0)))
    patches = jnp.stack([xs[:, :, k:k + T1] for k in range(K_TIME)], axis=2)  # (Bp, C, 25, T1)
    patches = patches.reshape(Bp, CK, T1).astype(jnp.bfloat16)

    def full_spec(a):
        n = a.ndim
        return pl.BlockSpec(a.shape, lambda g, n=n: (0,) * n)

    out = pl.pallas_call(
        _shallownet_kernel,
        out_shape=jax.ShapeDtypeStruct((Bp, OUTP), jnp.float32),
        grid=(Bp // Bt,),
        in_specs=[
            pl.BlockSpec((Bt, CK, T1), lambda g: (g, 0, 0)),
            full_spec(wc), full_spec(bct), full_spec(wz), full_spec(mask),
            full_spec(cs), full_spec(rs), full_spec(bout),
        ],
        out_specs=pl.BlockSpec((Bt, OUTP), lambda g: (g, 0)),
        compiler_params=pltpu.CompilerParams(dimension_semantics=("parallel",)),
    )(patches, wc, bct, wz, mask, cs, rs, bout)
    return out[:B, :out_dim]


def shallownet_reference(x, params):
    """Pure-JAX reference of the same (inference-mode) forward pass."""
    B, _, C, T = x.shape
    T1 = T - K_TIME + 1
    Tp = (T1 - POOL_W) // POOL_S + 1
    xs = x[:, 0].astype(jnp.float32)                                # (B, C, T)
    w1 = params["w1"][:, 0, 0, :]                                   # (40, 25)
    patches = jnp.stack([xs[:, :, k:k + T1] for k in range(K_TIME)], axis=-1)
    h1 = jnp.einsum('bctk,fk->bfct', patches, w1) + params["b1"][None, :, None, None]
    h2 = jnp.einsum('ofc,bfct->bot', params["w2"][:, :, :, 0], h1) \
        + params["b2"][None, :, None]
    inv_std = 1.0 / jnp.sqrt(params["bn_var"] + BN_EPS)
    h2 = (h2 - params["bn_mean"][None, :, None]) \
        * (params["bn_gamma"] * inv_std)[None, :, None] \
        + params["bn_beta"][None, :, None]
    h2 = jnp.where(h2 > 0, h2, jnp.expm1(h2))
    pooled = jnp.stack(
        [h2[:, :, POOL_S * p:POOL_S * p + POOL_W].mean(axis=-1) for p in range(Tp)],
        axis=-1)                                                    # (B, 40, Tp)
    flat = pooled.reshape(B, -1)
    return flat @ params["wout"].T + params["bout"]


def init_params(key, out_dim, C, T):
    ks = jax.random.split(key, 8)
    flat_dim = 1040 * (T // 200)
    return {
        "w1": 0.2 * jax.random.normal(ks[0], (F_MAPS, 1, 1, K_TIME), jnp.float32),
        "b1": 0.1 * jax.random.normal(ks[1], (F_MAPS,), jnp.float32),
        "w2": 0.05 * jax.random.normal(ks[2], (F_MAPS, F_MAPS, C, 1), jnp.float32),
        "b2": 0.1 * jax.random.normal(ks[3], (F_MAPS,), jnp.float32),
        "bn_gamma": 1.0 + 0.1 * jax.random.normal(ks[4], (F_MAPS,), jnp.float32),
        "bn_beta": 0.1 * jax.random.normal(ks[5], (F_MAPS,), jnp.float32),
        "bn_mean": jnp.zeros((F_MAPS,), jnp.float32),
        "bn_var": jnp.ones((F_MAPS,), jnp.float32),
        "wout": 0.05 * jax.random.normal(ks[6], (out_dim, flat_dim), jnp.float32),
        "bout": 0.1 * jax.random.normal(ks[7], (out_dim,), jnp.float32),
    }


if __name__ == "__main__":
    B, C, T, out_dim = 2, 4, 200, 32     # T=200 -> flatten dim 1040, as the module requires
    key = jax.random.PRNGKey(0)
    kx, kp = jax.random.split(key)
    x = jax.random.normal(kx, (B, 1, C, T), jnp.float32)
    params = init_params(kp, out_dim, C, T)

    out = shallownet_forward(x, params)
    out = jax.block_until_ready(out)

    ref = shallownet_reference(x, params)
    assert out.shape == (B, out_dim)
    max_err = float(jnp.max(jnp.abs(out - ref)))
    assert max_err < 5e-2, f"kernel/reference mismatch: max abs err {max_err}"
    print("KERNEL_OK")
</pallas_src>

<mosaic_0001>
module attributes {stable_mosaic.version = 11 : i64} {
  func.func @_shallownet_kernel(%arg0: i32, %arg1: memref<2x100x176xbf16, #tpu.memory_space<vmem>>, %arg2: memref<40x100xbf16, #tpu.memory_space<vmem>>, %arg3: memref<80x1xf32, #tpu.memory_space<vmem>>, %arg4: memref<176x1280xbf16, #tpu.memory_space<vmem>>, %arg5: memref<80x1280xbf16, #tpu.memory_space<vmem>>, %arg6: memref<1280x128xf32, #tpu.memory_space<vmem>>, %arg7: memref<2x80xf32, #tpu.memory_space<vmem>>, %arg8: memref<1x128xf32, #tpu.memory_space<vmem>>, %arg9: memref<2x128xf32, #tpu.memory_space<vmem>>) attributes {dimension_semantics = [#tpu.dimension_semantics<parallel>], iteration_bounds = array<i64: 1>, scalar_prefetch = 0 : i64, scratch_operands = 0 : i64, tpu.core_type = #tpu.core_type<tc>, window_params = [{transform_indices = @transform_0, window_bounds = array<i64: 2, 100, 176>}, {pipeline_mode = #tpu.pipeline_mode<synchronous>, transform_indices = @transform_1, window_bounds = array<i64: 40, 100>}, {pipeline_mode = #tpu.pipeline_mode<synchronous>, transform_indices = @transform_2, window_bounds = array<i64: 80, 1>}, {pipeline_mode = #tpu.pipeline_mode<synchronous>, transform_indices = @transform_3, window_bounds = array<i64: 176, 1280>}, {pipeline_mode = #tpu.pipeline_mode<synchronous>, transform_indices = @transform_4, window_bounds = array<i64: 80, 1280>}, {pipeline_mode = #tpu.pipeline_mode<synchronous>, transform_indices = @transform_5, window_bounds = array<i64: 1280, 128>}, {pipeline_mode = #tpu.pipeline_mode<synchronous>, transform_indices = @transform_6, window_bounds = array<i64: 2, 80>}, {pipeline_mode = #tpu.pipeline_mode<synchronous>, transform_indices = @transform_7, window_bounds = array<i64: 1, 128>}, {transform_indices = @transform_8, window_bounds = array<i64: 2, 128>}]} {
    %c0 = arith.constant 0 : index
    %c0_0 = arith.constant 0 : index
    %0 = vector.load %arg2[%c0, %c0_0] : memref<40x100xbf16, #tpu.memory_space<vmem>>, vector<40x100xbf16>
    %c0_1 = arith.constant 0 : index
    %c0_2 = arith.constant 0 : index
    %c0_3 = arith.constant 0 : index
    %1 = vector.load %arg1[%c0_1, %c0_2, %c0_3] : memref<2x100x176xbf16, #tpu.memory_space<vmem>>, vector<1x100x176xbf16>
    %2 = vector.shape_cast %1 : vector<1x100x176xbf16> to vector<100x176xbf16>
    %cst = arith.constant dense<0.000000e+00> : vector<40x176xf32>
    %3 = tpu.matmul %0, %2, %cst {dimension_numbers = #tpu.dot_dimension_numbers<[1], [0], [0], [1], [0, 0, 1, 1], [], []>} : vector<40x100xbf16>, vector<100x176xbf16>, vector<40x176xf32> -> vector<40x176xf32>
    %c1 = arith.constant 1 : index
    %c0_4 = arith.constant 0 : index
    %c0_5 = arith.constant 0 : index
    %4 = vector.load %arg1[%c1, %c0_4, %c0_5] : memref<2x100x176xbf16, #tpu.memory_space<vmem>>, vector<1x100x176xbf16>
    %5 = vector.shape_cast %4 : vector<1x100x176xbf16> to vector<100x176xbf16>
    %cst_6 = arith.constant dense<0.000000e+00> : vector<40x176xf32>
    %6 = tpu.matmul %0, %5, %cst_6 {dimension_numbers = #tpu.dot_dimension_numbers<[1], [0], [0], [1], [0, 0, 1, 1], [], []>} : vector<40x100xbf16>, vector<100x176xbf16>, vector<40x176xf32> -> vector<40x176xf32>
    %7 = tpu.concatenate %3, %6 in 0 : vector<40x176xf32>, vector<40x176xf32> -> vector<80x176xf32>
    %c0_7 = arith.constant 0 : index
    %c0_8 = arith.constant 0 : index
    %8 = vector.load %arg3[%c0_7, %c0_8] : memref<80x1xf32, #tpu.memory_space<vmem>>, vector<80x1xf32>
    %9 = vector.broadcast %8 : vector<80x1xf32> to vector<80x176xf32>
    %10 = arith.addf %7, %9 : vector<80x176xf32>
    %cst_9 = arith.constant 0.000000e+00 : f32
    %11 = vector.broadcast %cst_9 : f32 to vector<80x176xf32>
    %12 = arith.cmpf ogt, %10, %11 : vector<80x176xf32>
    %cst_10 = arith.constant 0.000000e+00 : f32
    %13 = vector.broadcast %cst_10 : f32 to vector<80x176xf32>
    %14 = arith.minimumf %10, %13 : vector<80x176xf32>
    %15 = math.exp %14 : vector<80x176xf32>
    %cst_11 = arith.constant 1.000000e+00 : f32
    %16 = vector.broadcast %cst_11 : f32 to vector<80x176xf32>
    %17 = arith.subf %15, %16 : vector<80x176xf32>
    %18 = arith.select %12, %10, %17 : vector<80x176xi1>, vector<80x176xf32>
    %19 = arith.truncf %18 : vector<80x176xf32> to vector<80x176xbf16>
    %c0_12 = arith.constant 0 : index
    %c0_13 = arith.constant 0 : index
    %20 = vector.load %arg4[%c0_12, %c0_13] : memref<176x1280xbf16, #tpu.memory_space<vmem>>, vector<176x1280xbf16>
    %cst_14 = arith.constant dense<0.000000e+00> : vector<80x1280xf32>
    %21 = tpu.matmul %19, %20, %cst_14 {dimension_numbers = #tpu.dot_dimension_numbers<[1], [0], [0], [1], [0, 0, 1, 1], [], []>} : vector<80x176xbf16>, vector<176x1280xbf16>, vector<80x1280xf32> -> vector<80x1280xf32>
    %c0_15 = arith.constant 0 : index
    %c0_16 = arith.constant 0 : index
    %22 = vector.load %arg5[%c0_15, %c0_16] : memref<80x1280xbf16, #tpu.memory_space<vmem>>, vector<80x1280xbf16>
    %23 = arith.extf %22 : vector<80x1280xbf16> to vector<80x1280xf32>
    %24 = arith.mulf %21, %23 : vector<80x1280xf32>
    %c0_17 = arith.constant 0 : index
    %c0_18 = arith.constant 0 : index
    %25 = vector.load %arg7[%c0_17, %c0_18] : memref<2x80xf32, #tpu.memory_space<vmem>>, vector<2x80xf32>
    %cst_19 = arith.constant dense<0.000000e+00> : vector<2x1280xf32>
    %26 = tpu.matmul %25, %24, %cst_19 {dimension_numbers = #tpu.dot_dimension_numbers<[1], [0], [0], [1], [0, 0, 1, 1], [], []>} : vector<2x80xf32>, vector<80x1280xf32>, vector<2x1280xf32> -> vector<2x1280xf32>
    %c0_20 = arith.constant 0 : index
    %c0_21 = arith.constant 0 : index
    %27 = vector.load %arg6[%c0_20, %c0_21] : memref<1280x128xf32, #tpu.memory_space<vmem>>, vector<1280x128xf32>
    %cst_22 = arith.constant dense<0.000000e+00> : vector<2x128xf32>
    %28 = tpu.matmul %26, %27, %cst_22 {dimension_numbers = #tpu.dot_dimension_numbers<[1], [0], [0], [1], [0, 0, 1, 1], [], []>} : vector<2x1280xf32>, vector<1280x128xf32>, vector<2x128xf32> -> vector<2x128xf32>
    %c0_23 = arith.constant 0 : index
    %c0_24 = arith.constant 0 : index
    %29 = vector.load %arg8[%c0_23, %c0_24] : memref<1x128xf32, #tpu.memory_space<vmem>>, vector<1x128xf32>
    %30 = vector.broadcast %29 : vector<1x128xf32> to vector<2x128xf32>
    %31 = arith.addf %28, %30 : vector<2x128xf32>
    %c0_25 = arith.constant 0 : index
    %c0_26 = arith.constant 0 : index
    %32 = vector.load %arg9[%c0_25, %c0_26] : memref<2x128xf32, #tpu.memory_space<vmem>>, vector<2x128xf32>
    tpu.vector_store %arg9[%c0_25, %c0_26], %31 {strides = array<i32>} : memref<2x128xf32, #tpu.memory_space<vmem>>, vector<2x128xf32>,
    return
  }
  func.func @transform_0(%arg0: i32) -> (i32, i32, i32) {
    %c0_i32 = arith.constant 0 : i32
    %c0_i32_0 = arith.constant 0 : i32
    %c0_i32_1 = arith.constant 0 : i32
    return %arg0, %c0_i32, %c0_i32_0 : i32, i32, i32
  }
  func.func @transform_1(%arg0: i32) -> (i32, i32) {
    %c0_i32 = arith.constant 0 : i32
    %c0_i32_0 = arith.constant 0 : i32
    %c0_i32_1 = arith.constant 0 : i32
    return %c0_i32, %c0_i32_0 : i32, i32
  }
  func.func @transform_2(%arg0: i32) -> (i32, i32) {
    %c0_i32 = arith.constant 0 : i32
    %c0_i32_0 = arith.constant 0 : i32
    %c0_i32_1 = arith.constant 0 : i32
    return %c0_i32, %c0_i32_0 : i32, i32
  }
  func.func @transform_3(%arg0: i32) -> (i32, i32) {
    %c0_i32 = arith.constant 0 : i32
    %c0_i32_0 = arith.constant 0 : i32
    %c0_i32_1 = arith.constant 0 : i32
    return %c0_i32, %c0_i32_0 : i32, i32
  }
  func.func @transform_4(%arg0: i32) -> (i32, i32) {
    %c0_i32 = arith.constant 0 : i32
    %c0_i32_0 = arith.constant 0 : i32
    %c0_i32_1 = arith.constant 0 : i32
    return %c0_i32, %c0_i32_0 : i32, i32
  }
  func.func @transform_5(%arg0: i32) -> (i32, i32) {
    %c0_i32 = arith.constant 0 : i32
    %c0_i32_0 = arith.constant 0 : i32
    %c0_i32_1 = arith.constant 0 : i32
    return %c0_i32, %c0_i32_0 : i32, i32
  }
  func.func @transform_6(%arg0: i32) -> (i32, i32) {
    %c0_i32 = arith.constant 0 : i32
    %c0_i32_0 = arith.constant 0 : i32
    %c0_i32_1 = arith.constant 0 : i32
    return %c0_i32, %c0_i32_0 : i32, i32
  }
  func.func @transform_7(%arg0: i32) -> (i32, i32) {
    %c0_i32 = arith.constant 0 : i32
    %c0_i32_0 = arith.constant 0 : i32
    %c0_i32_1 = arith.constant 0 : i32
    return %c0_i32, %c0_i32_0 : i32, i32
  }
  func.func @transform_8(%arg0: i32) -> (i32, i32) {
    %c0_i32 = arith.constant 0 : i32
    %c0_i32_0 = arith.constant 0 : i32
    return %arg0, %c0_i32 : i32, i32
  }
}

</mosaic_0001>

<bundles_post_ra>
// kernel: tpu_custom_call.1
= control target key start
LH: loop header
LB: loop body
LE: loop exit
PB: predicated region body
PF: predicated region fallthrough
CT: control target
= control target key end

     0   :  { %13 = vsyncpa [#allocation3], 0  ;;  %s4342_s0 = inlined_call_operand.vmem [shape: bf16[2,100,176], index: 0, kind: input, shape index: {}]   ;;  %s4343_s1 = inlined_call_operand.vmem [shape: bf16[40,100], index: 1, kind: input, shape index: {}]   ;;  %s4344_s2 = inlined_call_operand.vmem [shape: f32[80,1], index: 2, kind: input, shape index: {}]   ;;  %s4345_s3 = inlined_call_operand.hbm [shape: bf16[176,1280], index: 3, kind: input, shape index: {}]   ;;  %s4346_s4 = inlined_call_operand.vmem [shape: bf16[80,1280], index: 4, kind: input, shape index: {}]   ;;  %s4347_s5 = inlined_call_operand.hbm [shape: f32[1280,128], index: 5, kind: input, shape index: {}]   ;;  %s4348_s6 = inlined_call_operand.vmem [shape: f32[2,80], index: 6, kind: input, shape index: {}]   ;;  %s4349_s7 = inlined_call_operand.vmem [shape: f32[1,128], index: 7, kind: input, shape index: {}]   ;;  %s4350_s8 = inlined_call_operand.hbm [shape: f32[2,128], index: 8, kind: output, shape index: {}]  }
   0x1   :  { %14 = vsyncpa [#allocation6], 0 }
   0x2   :  { %15 = vsyncpa [#allocation4], 0  ;;  %s3537_s27 = smov [#allocation2]  }
   0x3   :  { %s27_s28 = sshll.u32 %s3537_s27, 4  ;;  %s28_s28 = int_to_ptr.vmem [resolvable:$true] %s27_s28 }
   0x4   :  { %s3479_s29 = scalar_lea.vmem %s28_s28, 14080  ;;  %p3484_p1 = scmp.lt.s32.totalorder %s28_s28, %s28_s28 }
   0x5   :  { %p3480_p0 = scmp.ne.s32.totalorder %s28_s28, %s3479_s29  ;;  %p3485_p2 = scmp.lt.s32.totalorder %s3479_s29, %s3479_s29 }
   0x7   :  { %p3486_p3 = por %p3485_p2, %p3484_p1 }
   0x9   :  { %p3487_p4 = pnand %p3486_p3, %p3480_p0 }
   0xb   :  { %3490 = shalt.err (!%p3487_p4)
}
   0xc   :  { %s3538_s30 = smov 640   ;;  %s3539_s9 = smov 40  }
   0xd   :  { %33 = dma.hbm_to_vmem [thread:$0]  %s4345_s3, 14080, %s28_s28, [#allocation3], %s3538_s30, %s3538_s30, %s3539_s9  }
   0xe   :  { %s3540_s12 = smov [#allocation5]  }
   0xf   :  { %s41_s13 = sshll.u32 %s3540_s12, 4  ;;  %s42_s13 = int_to_ptr.vmem [resolvable:$true] %s41_s13 }
  0x10   :  { %s3499_s14 = scalar_lea.vmem %s42_s13, 20480  ;;  %p3504_p6 = scmp.lt.s32.totalorder %s42_s13, %s42_s13 }
  0x11   :  { %p3500_p5 = scmp.ne.s32.totalorder %s42_s13, %s3499_s14  ;;  %p3505_p7 = scmp.lt.s32.totalorder %s3499_s14, %s3499_s14 }
  0x13   :  { %p3506_p8 = por %p3505_p7, %p3504_p6 }
  0x15   :  { %p3507_p9 = pnand %p3506_p8, %p3500_p5 }
  0x17   :  { %3510 = shalt.err (!%p3507_p9)
}
  0x18   :  { %s3541_s15 = smov 128   ;;  %s3542_s16 = smov 8  }
  0x19   :  { %47 = dma.hbm_to_vmem [thread:$0]  %s4347_s5, 20480, %s42_s13, [#allocation6], %s3541_s15, %s3541_s15, %s3542_s16  }
  0x1a   :  { %3531 = dma.done.wait [#allocation3], 14080  }
  0x1b   :  { %3532 = vsyncadd [#allocation3], 4294953216 }
  0x1c   :  { %3533 = dma.done.wait [#allocation6], 20480  }
  0x1d   :  { %3534 = vsyncadd [#allocation6], 4294946816  ;;  %v3543_v0 = vmov 0   ;;  %v76_v1 = vld [vmem:[%s4342_s0 + $0x60] sm:$0x33]  ;;  %vm165_vm0 = vcmask 1041408  }
  0x1e   :  { %204 = vmatprep.mubr.bf16.mxu0 %v3543_v0  ;;  %350 = vmatprep.mubr.bf16.mxu1 %v3543_v0  ;;  %v2857_v2 = vld [vmem:[%s4342_s0 + $0xc8] sm:$0x33]  ;;  %v2840_v3 = vcombine.high %v76_v1, %v76_v1  ;;  %v2839_v5 = vcombine.low %v76_v1, %v76_v1  ;;  %v3227_v7 = vld [vmem:[%s4342_s0 + $0x54] ss:$8 sps:$4 sm:$0xff]   ;;  %v3231_v11 = vld [vmem:[%s4342_s0 + $0x50] ss:$8 sps:$4 sm:$0xff]  }
  0x1f   :  { %3221 = vset.pattern.permute.xlu0 %v3543_v0  ;;  %3222 = vset.pattern.permute.xlu1 %v3543_v0  ;;  %v2871_v4 = vcombine.high %v2857_v2, %v2857_v2  ;;  %v2870_v6 = vcombine.low %v2857_v2, %v2857_v2  ;;  %v3229_v8 = vld [vmem:[%s4342_s0 + $0xbc] ss:$8 sps:$4 sm:$0xff]   ;;  %v3232_v12 = vld [vmem:[%s4342_s0 + $0xb8] ss:$8 sps:$4 sm:$0xff]   ;;  %v3235_v14 = vld [vmem:[%s4342_s0 + $0xac] ss:$8 sps:$4 sm:$0xff]  }
  0x20   :  { %2841 = vmatprep.subr.msk.bf16.mxu0 %vm165_vm0, %v2840_v3  ;;  %v167_v9 = vsel %vm165_vm0, %v2839_v5, 0  ;;  %v3233_v13 = vld [vmem:[%s4342_s0 + $0x44] ss:$8 sps:$4 sm:$0xff]   ;;  %v3237_v15 = vld [vmem:[%s4342_s0 + $0x40] ss:$8 sps:$4 sm:$0xff]   ;;  %v381_v30 = vld [vmem:[%s4344_s2 + $0x10] sm:$0xff] }
  0x21   :  { %2872 = vmatprep.subr.msk.bf16.mxu1 %vm165_vm0, %v2871_v4  ;;  %v313_v10 = vsel %vm165_vm0, %v2870_v6, 0  ;;  %175 = vmatpush1.bf16.msra.mxu0 %v167_v9  ;;  %v3238_v16 = vld [vmem:[%s4342_s0 + $0xa8] ss:$8 sps:$4 sm:$0xff]   ;;  %v3239_v17 = vld [vmem:[%s4342_s0 + $0x34] ss:$8 sps:$4 sm:$0xff]   ;;  %v379_v27 = vld [vmem:[%s4344_s2] sm:$0xff] }
  0x22   :  { %321 = vmatpush1.bf16.msra.mxu1 %v313_v10  ;;  %176 = vmatprep.subr.bf16.mxu0 %v3227_v7  ;;  %v3241_v18 = vld [vmem:[%s4342_s0 + $0x9c] ss:$8 sps:$4 sm:$0xff]   ;;  %v3243_v19 = vld [vmem:[%s4342_s0 + $0x30] ss:$8 sps:$4 sm:$0xff]   ;;  %v3247_v22 = vld [vmem:[%s4342_s0 + $0x8c] ss:$8 sps:$4 sm:$0xff]  }
  0x23   :  { %322 = vmatprep.subr.bf16.mxu1 %v3229_v8  ;;  %v3244_v20 = vld [vmem:[%s4342_s0 + $0x98] ss:$8 sps:$4 sm:$0xff]   ;;  %v3245_v21 = vld [vmem:[%s4342_s0 + $0x24] ss:$8 sps:$4 sm:$0xff]   ;;  %v3250_v24 = vld [vmem:[%s4342_s0 + $0x88] ss:$8 sps:$4 sm:$0xff]   ;;  %391 = vperm.xlu0 %3221, %v379_v27  }
  0x24   :  { %v3249_v23 = vld [vmem:[%s4342_s0 + $0x20] ss:$8 sps:$4 sm:$0xff]   ;;  %v3251_v25 = vld [vmem:[%s4342_s0 + $0x14] ss:$8 sps:$4 sm:$0xff]   ;;  %v3255_v28 = vld [vmem:[%s4342_s0 + $0x10] ss:$8 sps:$4 sm:$0xff]   ;;  %401 = vperm.xlu1 %3222, %v381_v30  }
  0x25   :  { %177 = vmatpush1.bf16.msra.mxu0 %v3231_v11  ;;  %v3253_v26 = vld [vmem:[%s4342_s0 + $0x7c] ss:$8 sps:$4 sm:$0xff]   ;;  %v3256_v29 = vld [vmem:[%s4342_s0 + $0x78] ss:$8 sps:$4 sm:$0xff]   ;;  %v3259_v32 = vld [vmem:[%s4342_s0 + $0x6c] ss:$8 sps:$4 sm:$0xff]  }
  0x26   :  { %323 = vmatpush1.bf16.msra.mxu1 %v3232_v12  ;;  %178 = vmatprep.subr.bf16.mxu0 %v3233_v13  ;;  %v3257_v31 = vld [vmem:[%s4342_s0 + $0x4] ss:$8 sps:$4 sm:$0xff]   ;;  %v3261_v33 = vld [vmem:[%s4342_s0] ss:$8 sps:$4 sm:$0xff]   ;;  %v382_v36 = vld [vmem:[%s4344_s2 + $0x18] sm:$0xff]  ;;  %vm155_vm1 = vcmask 818176  }
  0x27   :  { %324 = vmatprep.subr.bf16.mxu1 %v3235_v14  ;;  %v3262_v34 = vld [vmem:[%s4342_s0 + $0x68] ss:$8 sps:$4 sm:$0xff]   ;;  %v3268_v37 = vld [vmem:[#allocation2 + $0x234] ss:$40 sps:$4 sm:$0xff]   ;;  %v3263_v39 = vld [vmem:[%s4343_s1] sm:$0xff]   ;;  %vm1249_vm2 = vcmask 392192  }
  0x28   :  { %v380_v35 = vld [vmem:[%s4344_s2 + $0x8] sm:$0xff]  ;;  %v3271_v38 = vld [vmem:[#allocation2 + $0x23c] ss:$40 sps:$4 sm:$0xff]   ;;  %406 = vperm.xlu1 %3222, %v382_v36   ;;  %v3266_v42 = vld [vmem:[#allocation2 + $0x230] ss:$40 sps:$4 sm:$0xff]   ;;  %s3545_s16 = smov [#allocation7]  }
  0x29   :  { %179 = vmatpush1.bf16.msra.mxu0 %v3237_v15  ;;  %396 = vperm.xlu0 %3221, %v380_v35   ;;  %v383_v40 = vld [vmem:[%s4344_s2 + $0x20] sm:$0xff]  ;;  %v384_v41 = vld [vmem:[%s4344_s2 + $0x28] sm:$0xff]  ;;  %v385_v43 = vld [vmem:[%s4344_s2 + $0x30] sm:$0xff]  ;;  %s2814_s17 = sshll.u32 %s3545_s16, 4  ;;  %s2815_s17 = int_to_ptr.vmem [resolvable:$true] %s2814_s17 }
  0x2a   :  { %325 = vmatpush1.bf16.msra.mxu1 %v3238_v16  ;;  %180 = vmatprep.subr.bf16.mxu0 %v3239_v17  ;;  %v386_v44 = vld [vmem:[%s4344_s2 + $0x38] sm:$0xff]  ;;  %v3274_v46 = vld [vmem:[#allocation2 + $0x1e4] ss:$40 sps:$4 sm:$0xff]   ;;  %v3272_v48 = vld [vmem:[#allocation2 + $0x1e0] ss:$40 sps:$4 sm:$0xff]   ;;  %s3511_s18 = scalar_lea.vmem %s2815_s17, 32  ;;  %p3516_p11 = scmp.lt.s32.totalorder %s2815_s17, %s2815_s17 }
  0x2b   :  { %326 = vmatprep.subr.bf16.mxu1 %v3241_v18  ;;  %v3269_v45 = vld [vmem:[#allocation2 + $0x238] ss:$40 sps:$4 sm:$0xff]   ;;  %v3277_v47 = vld [vmem:[#allocation2 + $0x1ec] ss:$40 sps:$4 sm:$0xff]   ;;  %v3275_v49 = vld [vmem:[#allocation2 + $0x1e8] ss:$40 sps:$4 sm:$0xff]   ;;  %p3512_p10 = scmp.ne.s32.totalorder %s2815_s17, %s3511_s18  ;;  %p3517_p12 = scmp.lt.s32.totalorder %s3511_s18, %s3511_s18 }
  0x2c   :  { %416 = vperm.xlu1 %3222, %v384_v41   ;;  %v3264_v50 = vld [vmem:[%s4343_s1 + $0x8] sm:$0xff]   ;;  %v387_v51 = vld [vmem:[%s4344_s2 + $0x40] sm:$0xff]  ;;  %v3280_v53 = vld [vmem:[#allocation2 + $0x194] ss:$40 sps:$4 sm:$0xff]  }
  0x2d   :  { %181 = vmatpush1.bf16.msra.mxu0 %v3243_v19  ;;  %411 = vperm.xlu0 %3221, %v383_v40   ;;  %v388_v52 = vld [vmem:[%s4344_s2 + $0x48] sm:$0xff]  ;;  %v3283_v54 = vld [vmem:[#allocation2 + $0x19c] ss:$40 sps:$4 sm:$0xff]   ;;  %v3278_v55 = vld [vmem:[#allocation2 + $0x190] ss:$40 sps:$4 sm:$0xff]   ;;  %p3518_p13 = por %p3517_p12, %p3516_p11 }
  0x2e   :  { %327 = vmatpush1.bf16.msra.mxu1 %v3244_v20  ;;  %182 = vmatprep.subr.bf16.mxu0 %v3245_v21  ;;  %v3281_v56 = vld [vmem:[#allocation2 + $0x198] ss:$40 sps:$4 sm:$0xff]   ;;  %v3265_v57 = vld [vmem:[%s4343_s1 + $0x10] ss:$0 sps:$4 sm:$0xff]   ;;  %v3286_v58 = vld [vmem:[#allocation2 + $0x144] ss:$40 sps:$4 sm:$0xff]  }
  0x2f   :  { %328 = vmatprep.subr.bf16.mxu1 %v3247_v22  ;;  %v3289_v59 = vld [vmem:[#allocation2 + $0x14c] ss:$40 sps:$4 sm:$0xff]   ;;  %v3284_v60 = vld [vmem:[#allocation2 + $0x140] ss:$40 sps:$4 sm:$0xff]   ;;  %v3295_v63 = vld [vmem:[#allocation2 + $0xfc] ss:$40 sps:$4 sm:$0xff]   ;;  %p3519_p0 = pnand %p3518_p13, %p3512_p10 }
  0x30   :  { %426 = vperm.xlu1 %3222, %v386_v44   ;;  %v3287_v61 = vld [vmem:[#allocation2 + $0x148] ss:$40 sps:$4 sm:$0xff]   ;;  %v3292_v62 = vld [vmem:[#allocation2 + $0xf4] ss:$40 sps:$4 sm:$0xff]   ;;  %v3293_v1 = vld [vmem:[#allocation2 + $0xf8] ss:$40 sps:$4 sm:$0xff]  }
  0x31   :  { %183 = vmatpush1.bf16.msra.mxu0 %v3249_v23  ;;  %421 = vperm.xlu0 %3221, %v385_v43   ;;  %v3298_v2 = vld [vmem:[#allocation2 + $0xa4] ss:$40 sps:$4 sm:$0xff]   ;;  %v3296_v4 = vld [vmem:[#allocation2 + $0xa0] ss:$40 sps:$4 sm:$0xff]   ;;  %v3304_v6 = vld [vmem:[#allocation2 + $0x54] ss:$40 sps:$4 sm:$0xff]  }
  0x32   :  { %329 = vmatpush1.bf16.msra.mxu1 %v3250_v24  ;;  %184 = vmatprep.subr.bf16.mxu0 %v3251_v25  ;;  %v3301_v3 = vld [vmem:[#allocation2 + $0xac] ss:$40 sps:$4 sm:$0xff]   ;;  %v3299_v5 = vld [vmem:[#allocation2 + $0xa8] ss:$40 sps:$4 sm:$0xff]   ;;  %v3307_v7 = vld [vmem:[#allocation2 + $0x5c] ss:$40 sps:$4 sm:$0xff]  }
  0x33   :  { %330 = vmatprep.subr.bf16.mxu1 %v3253_v26  ;;  %v3302_v8 = vld [vmem:[#allocation2 + $0x50] ss:$40 sps:$4 sm:$0xff]   ;;  %v3310_v10 = vld [vmem:[#allocation2 + $0x4] ss:$40 sps:$4 sm:$0xff]   ;;  %v3308_v12 = vld [vmem:[#allocation2] ss:$40 sps:$4 sm:$0xff]  }
  0x34   :  { %436 = vperm.xlu1 %3222, %v388_v52   ;;  %v3305_v9 = vld [vmem:[#allocation2 + $0x58] ss:$40 sps:$4 sm:$0xff]   ;;  %v3313_v11 = vld [vmem:[#allocation2 + $0xc] ss:$40 sps:$4 sm:$0xff]   ;;  %v3311_v13 = vld [vmem:[#allocation2 + $0x8] ss:$40 sps:$4 sm:$0xff]  }
  0x35   :  { %185 = vmatpush1.bf16.msra.mxu0 %v3255_v28  ;;  %431 = vperm.xlu0 %3221, %v387_v51   ;;  %v3316_v14 = vld [vmem:[#allocation2 + $0x324] ss:$40 sps:$4 sm:$0xff]   ;;  %v3314_v16 = vld [vmem:[#allocation2 + $0x320] ss:$40 sps:$4 sm:$0xff]   ;;  %v3322_v18 = vld [vmem:[#allocation2 + $0x2d4] ss:$40 sps:$4 sm:$0xff]  }
  0x36   :  { %331 = vmatpush1.bf16.msra.mxu1 %v3256_v29  ;;  %186 = vmatprep.subr.bf16.mxu0 %v3257_v31  ;;  %v3319_v15 = vld [vmem:[#allocation2 + $0x32c] ss:$40 sps:$4 sm:$0xff]   ;;  %v3317_v17 = vld [vmem:[#allocation2 + $0x328] ss:$40 sps:$4 sm:$0xff]   ;;  %v3325_v19 = vld [vmem:[#allocation2 + $0x2dc] ss:$40 sps:$4 sm:$0xff]  }
  0x37   :  { %332 = vmatprep.subr.bf16.mxu1 %v3259_v32  ;;  %v3320_v20 = vld [vmem:[#allocation2 + $0x2d0] ss:$40 sps:$4 sm:$0xff]   ;;  %v3328_v22 = vld [vmem:[#allocation2 + $0x284] ss:$40 sps:$4 sm:$0xff]   ;;  %v3326_v24 = vld [vmem:[#allocation2 + $0x280] ss:$40 sps:$4 sm:$0xff]  }
  0x38   :  { %v3323_v21 = vld [vmem:[#allocation2 + $0x2d8] ss:$40 sps:$4 sm:$0xff]   ;;  %v3331_v23 = vld [vmem:[#allocation2 + $0x28c] ss:$40 sps:$4 sm:$0xff]   ;;  %v3329_v25 = vld [vmem:[#allocation2 + $0x288] ss:$40 sps:$4 sm:$0xff]  }
  0x39   :  { %187 = vmatpush1.bf16.msra.mxu0 %v3261_v33  ;;  %v3334_v26 = vld [vmem:[#allocation2 + $0x244] ss:$40 sps:$4 sm:$0xff]  }
  0x3a   :  { %333 = vmatpush1.bf16.msra.mxu1 %v3262_v34  ;;  %1265 = vmatprep.subr.bf16.mxu0 %v3268_v37  ;;  %v3337_v27 = vld [vmem:[#allocation2 + $0x24c] ss:$40 sps:$4 sm:$0xff]  }
  0x3b   :  { %1348 = vmatprep.subr.bf16.mxu1 %v3271_v38 }
  0x3c   :  { %2842 = vmatmul.mubr.msk.bf16.vlgmr.msra.gmra.mxu0 %vm155_vm1, %v3263_v39 }
  0x3d   :  { %2873 = vmatmul.mubr.msk.bf16.vlgmr.msra.gmra.mxu1 %vm155_vm1, %v3263_v39  ;;  %214 = vmatprep.mubr.bf16.mxu0 %v3543_v0 }
  0x3e   :  { %360 = vmatprep.mubr.bf16.mxu1 %v3543_v0  ;;  %1266 = vmatpush1.bf16.msra.mxu0 %v3266_v42 }
  0x3f   :  { %1349 = vmatpush1.bf16.msra.mxu1 %v3269_v45  ;;  %1267 = vmatprep.subr.bf16.mxu0 %v3274_v46 }
  0x40   :  { %1350 = vmatprep.subr.bf16.mxu1 %v3277_v47 }
  0x42   :  { %1268 = vmatpush1.bf16.msra.mxu0 %v3272_v48 }
  0x43   :  { %1351 = vmatpush1.bf16.msra.mxu1 %v3275_v49  ;;  %1269 = vmatprep.subr.bf16.mxu0 %v3280_v53 }
  0x44   :  { %2843 = vmatmul.mubr.msk.bf16.gmra.mxu0 %vm155_vm1, %v3264_v50  ;;  %1352 = vmatprep.subr.bf16.mxu1 %v3283_v54 }
  0x45   :  { %2874 = vmatmul.mubr.msk.bf16.gmra.mxu1 %vm155_vm1, %v3264_v50  ;;  %224 = vmatprep.mubr.bf16.mxu0 %v3543_v0 }
  0x46   :  { %370 = vmatprep.mubr.bf16.mxu1 %v3543_v0  ;;  %1270 = vmatpush1.bf16.msra.mxu0 %v3278_v55  ;;  %v3290_v0 = vld [vmem:[#allocation2 + $0xf0] ss:$40 sps:$4 sm:$0xff]  }
  0x47   :  { %1353 = vmatpush1.bf16.msra.mxu1 %v3281_v56  ;;  %1271 = vmatprep.subr.bf16.mxu0 %v3286_v58 }
  0x48   :  { %1354 = vmatprep.subr.bf16.mxu1 %v3289_v59 }
  0x4a   :  { %1272 = vmatpush1.bf16.msra.mxu0 %v3284_v60 }
  0x4b   :  { %1355 = vmatpush1.bf16.msra.mxu1 %v3287_v61  ;;  %1273 = vmatprep.subr.bf16.mxu0 %v3292_v62 }
  0x4c   :  { %2844 = vmatmul.mubr.msk.bf16.gmra.mxu0 %vm155_vm1, %v3265_v57  ;;  %1356 = vmatprep.subr.bf16.mxu1 %v3295_v63 }
  0x4d   :  { %2875 = vmatmul.mubr.msk.bf16.gmra.mxu1 %vm155_vm1, %v3265_v57 }
  0x4e   :  { %1274 = vmatpush1.bf16.msra.mxu0 %v3290_v0 }
  0x4f   :  { %1357 = vmatpush1.bf16.msra.mxu1 %v3293_v1  ;;  %1275 = vmatprep.subr.bf16.mxu0 %v3298_v2 }
  0x50   :  { %1358 = vmatprep.subr.bf16.mxu1 %v3301_v3 }
  0x52   :  { %1276 = vmatpush1.bf16.msra.mxu0 %v3296_v4 }
  0x53   :  { %1359 = vmatpush1.bf16.msra.mxu1 %v3299_v5  ;;  %1277 = vmatprep.subr.bf16.mxu0 %v3304_v6 }
  0x54   :  { %1360 = vmatprep.subr.bf16.mxu1 %v3307_v7 }
  0x56   :  { %1278 = vmatpush1.bf16.msra.mxu0 %v3302_v8 }
  0x57   :  { %1361 = vmatpush1.bf16.msra.mxu1 %v3305_v9  ;;  %1279 = vmatprep.subr.bf16.mxu0 %v3310_v10 }
  0x58   :  { %1362 = vmatprep.subr.bf16.mxu1 %v3313_v11 }
  0x5a   :  { %1280 = vmatpush1.bf16.msra.mxu0 %v3308_v12 }
  0x5b   :  { %1363 = vmatpush1.bf16.msra.mxu1 %v3311_v13  ;;  %1291 = vmatprep.subr.bf16.mxu0 %v3316_v14 }
  0x5c   :  { %1374 = vmatprep.subr.bf16.mxu1 %v3319_v15 }
  0x5e   :  { %1292 = vmatpush2.bf16.msra.mxu0 %v3314_v16 }
  0x5f   :  { %1375 = vmatpush2.bf16.msra.mxu1 %v3317_v17  ;;  %1293 = vmatprep.subr.bf16.mxu0 %v3322_v18 }
  0x60   :  { %1376 = vmatprep.subr.bf16.mxu1 %v3325_v19 }
  0x62   :  { %1294 = vmatpush2.bf16.msra.mxu0 %v3320_v20 }
  0x63   :  { %1377 = vmatpush2.bf16.msra.mxu1 %v3323_v21  ;;  %1295 = vmatprep.subr.bf16.mxu0 %v3328_v22 }
  0x64   :  { %1378 = vmatprep.subr.bf16.mxu1 %v3331_v23 }
  0x66   :  { %1296 = vmatpush2.bf16.msra.mxu0 %v3326_v24 }
  0x67   :  { %1379 = vmatpush2.bf16.msra.mxu1 %v3329_v25  ;;  %1431 = vmatprep.subr.bf16.mxu0 %v3334_v26 }
  0x68   :  { %1514 = vmatprep.subr.bf16.mxu1 %v3337_v27 }
  0x9e   :  { %v392_v28 = vpop.permute.xlu0 %391 }
  0x9f   :  { %v402_v29 = vpop.permute.xlu1 %401 }
  0xa3   :  { %v407_v40 = vpop.permute.xlu1 %406 }
  0xa4   :  { %v397_v35 = vpop.permute.xlu0 %396 }
  0xa7   :  { %v417_v55 = vpop.permute.xlu1 %416 }
  0xa8   :  { %v412_v60 = vpop.permute.xlu0 %411 }
  0xab   :  { %v427_v7 = vpop.permute.xlu1 %426 }
  0xac   :  { %v422_v13 = vpop.permute.xlu0 %421 }
  0xfc   :  { %v206_v30 = vpop.f32.mrf.mxu0 }
  0xfd   :  { %v352_v31 = vpop.f32.mrf.mxu1  ;;  %v3728_v32 = vadd.f32 %v392_v28, %v206_v30 }
  0xfe   :  { %v208_v33 = vpop.f32.mrf.mxu0  ;;  %v3749_v1 = vadd.f32 %v417_v55, %v352_v31 }
  0xff   :  { %v354_v34 = vpop.f32.mrf.mxu1  ;;  %v479_v36 = vmin.f32 %v3728_v32, 0.0  ;;  %v3731_v37 = vadd.f32 %v392_v28, %v208_v33  ;;  %vm459_vm3 = vcmp.gt.f32.partialorder %v3728_v32, 0.0 }
 0x100   :  { %v210_v38 = vpop.f32.mrf.mxu0  ;;  %v3757_v9 = vadd.f32 %v417_v55, %v354_v34  ;;  %v489_v14 = vmin.f32 %v3749_v1, 0.0  ;;  %vm469_vm14 = vcmp.gt.f32.partialorder %v3749_v1, 0.0 }
 0x101   :  { %v3733_v39 = vpop.f32.mrf.mxu1  ;;  %v3735_v41 = vadd.f32 %v397_v35, %v210_v38  ;;  %v499_v42 = vmul.f32 1.442695, %v479_v36  ;;  %v480_v43 = vmin.f32 %v3731_v37, 0.0  ;;  %vm460_vm4 = vcmp.gt.f32.partialorder %v3731_v37, 0.0 }
 0x102   :  { %v212_v44 = vpop.f32.mrf.mxu0  ;;  %v490_v23 = vmin.f32 %v3757_v9, 0.0  ;;  %v519_v27 = vmul.f32 1.442695, %v489_v14  ;;  %v3772_v31 = vadd.f32 %v422_v13, %v3733_v39  ;;  %vm470_vm12 = vcmp.gt.f32.partialorder %v3757_v9, 0.0 }
 0x103   :  { %v358_v45 = vpop.f32.mrf.mxu1  ;;  %v481_v46 = vmin.f32 %v3735_v41, 0.0  ;;  %v501_v47 = vmul.f32 1.442695, %v480_v43  ;;  %v3739_v51 = vadd.f32 %v397_v35, %v212_v44  ;;  %3431 = vpow2.f32 %v499_v42  ;;  %v437_v43 = vpop.permute.xlu1 %436 }
 0x104   :  { %v216_v48 = vpop.f32.mrf.mxu0  ;;  %v3766_v21 = vadd.f32 %v422_v13, %v358_v45  ;;  %v521_v38 = vmul.f32 1.442695, %v490_v23  ;;  %vm461_vm5 = vcmp.gt.f32.partialorder %v3735_v41, 0.0  ;;  %v3346_v23 = vld [vmem:[#allocation2 + $0x1a4] ss:$40 sps:$4 sm:$0xff]  }
 0x105   :  { %v362_v49 = vpop.f32.mrf.mxu1  ;;  %v503_v50 = vmul.f32 1.442695, %v481_v46  ;;  %v3741_v52 = vadd.f32 %v402_v29, %v216_v48  ;;  %3433 = vpow2.f32 %v501_v47  ;;  %v482_v56 = vmin.f32 %v3739_v51, 0.0  ;;  %v432_v48 = vpop.permute.xlu0 %431 }
 0x106   :  { %v218_v53 = vpop.f32.mrf.mxu0  ;;  %v3774_v33 = vadd.f32 %v427_v7, %v362_v49  ;;  %v492_v36 = vmin.f32 %v3766_v21, 0.0  ;;  %v491_v49 = vmin.f32 %v3772_v31, 0.0  ;;  %vm462_vm6 = vcmp.gt.f32.partialorder %v3739_v51, 0.0 }
 0x107   :  { %v364_v54 = vpop.f32.mrf.mxu1  ;;  %3435 = vpow2.f32 %v503_v50  ;;  %v483_v57 = vmin.f32 %v3741_v52, 0.0  ;;  %v505_v61 = vmul.f32 1.442695, %v482_v56  ;;  %v3747_v62 = vadd.f32 %v402_v29, %v218_v53 }
 0x108   :  { %v220_v58 = vpop.f32.mrf.mxu0  ;;  %v3760_v15 = vadd.f32 %v427_v7, %v364_v54  ;;  %v493_v50 = vmin.f32 %v3774_v33, 0.0  ;;  %v525_v55 = vmul.f32 1.442695, %v492_v36  ;;  %v3335_v7 = vld [vmem:[#allocation2 + $0x248] ss:$40 sps:$4 sm:$0xff]   ;;  %vm463_vm8 = vcmp.gt.f32.partialorder %v3741_v52, 0.0 }
 0x109   :  { %v3745_v59 = vpop.f32.mrf.mxu1  ;;  %3437 = vpow2.f32 %v505_v61  ;;  %v3751_v2 = vadd.f32 %v407_v40, %v220_v58  ;;  %v507_v3 = vmul.f32 1.442695, %v483_v57  ;;  %v484_v4 = vmin.f32 %v3747_v62, 0.0 }
 0x10a   :  { %v222_v63 = vpop.f32.mrf.mxu0  ;;  %v494_v28 = vmin.f32 %v3760_v15, 0.0  ;;  %v523_v14 = vmul.f32 1.442695, %v491_v49  ;;  %vm464_vm9 = vcmp.gt.f32.partialorder %v3747_v62, 0.0  ;;  %v3352_v49 = vld [vmem:[#allocation2 + $0x154] ss:$40 sps:$4 sm:$0xff]  }
 0x10b   :  { %v368_v0 = vpop.f32.mrf.mxu1  ;;  %v485_v8 = vmin.f32 %v3751_v2, 0.0  ;;  %v509_v10 = vmul.f32 1.442695, %v484_v4  ;;  %v3762_v17 = vadd.f32 %v407_v40, %v222_v63  ;;  %3439 = vpow2.f32 %v507_v3 }
 0x10c   :  { %v226_v5 = vpop.f32.mrf.mxu0  ;;  %v529_v44 = vmul.f32 1.442695, %v494_v28  ;;  %v3787_v56 = vadd.f32 %v432_v48, %v368_v0  ;;  %v3332_v0 = vld [vmem:[#allocation2 + $0x240] ss:$40 sps:$4 sm:$0xff]   ;;  %vm465_vm7 = vcmp.gt.f32.partialorder %v3751_v2, 0.0  ;;  %vm474_vm15 = vcmp.gt.f32.partialorder %v3760_v15, 0.0 }
 0x10d   :  { %v3754_v6 = vpop.f32.mrf.mxu1  ;;  %v511_v16 = vmul.f32 1.442695, %v485_v8  ;;  %v3764_v18 = vadd.f32 %v412_v60, %v226_v5  ;;  %3441 = vpow2.f32 %v509_v10  ;;  %v486_v22 = vmin.f32 %v3762_v17, 0.0 }
 0x10e   :  { %v228_v11 = vpop.f32.mrf.mxu0  ;;  %vm466_vm10 = vcmp.gt.f32.partialorder %v3762_v17, 0.0  ;;  %vm472_vm0 = vcmp.gt.f32.partialorder %v3766_v21, 0.0  ;;  %vm473_vm1 = vcmp.gt.f32.partialorder %v3774_v33, 0.0 }
 0x10f   :  { %v374_v12 = vpop.f32.mrf.mxu1  ;;  %3443 = vpow2.f32 %v511_v16  ;;  %v513_v29 = vmul.f32 1.442695, %v486_v22  ;;  %v487_v34 = vmin.f32 %v3764_v18, 0.0  ;;  %v3781_v45 = vadd.f32 %v412_v60, %v228_v11  ;;  %v3340_v11 = vld [vmem:[#allocation2 + $0x1f4] ss:$40 sps:$4 sm:$0xff]  }
 0x110   :  { %v230_v19 = vpop.f32.mrf.mxu0  ;;  %v3432_v26 = vpop.eup %3431  ;;  %v3785_v53 = vadd.f32 %v437_v43, %v374_v12  ;;  %v3343_v12 = vld [vmem:[#allocation2 + $0x1fc] ss:$40 sps:$4 sm:$0xff]   ;;  %v3815_v16 = vadd.f32 %v432_v48, %v3745_v59  ;;  %v3341_v22 = vld [vmem:[#allocation2 + $0x1f8] ss:$40 sps:$4 sm:$0xff]   ;;  %v3349_v59 = vld [vmem:[#allocation2 + $0x1ac] ss:$40 sps:$4 sm:$0xff]  }
 0x111   :  { %v376_v20 = vpop.f32.mrf.mxu1  ;;  %3445 = vpow2.f32 %v513_v29  ;;  %v515_v42 = vmul.f32 1.442695, %v487_v34  ;;  %v2876_v47 = vadd.f32 -1.0, %v3432_v26  ;;  %v488_v58 = vmin.f32 %v3781_v45, 0.0 }
 0x112   :  { %v231_v24 = vpop.f32.mrf.mxu0  ;;  %v3434_v30 = vpop.eup %3433  ;;  %3447 = vpow2.f32 %v519_v27  ;;  %v498_v63 = vmin.f32 %v3785_v53, 0.0  ;;  %v495_v29 = vmin.f32 %v3815_v16, 0.0  ;;  %vm467_vm11 = vcmp.gt.f32.partialorder %v3764_v18, 0.0 }
 0x113   :  { %v377_v25 = vpop.f32.mrf.mxu1  ;;  %v2877_v39 = vadd.f32 -1.0, %v3434_v30  ;;  %3449 = vpow2.f32 %v515_v42  ;;  %v559_v3 = vsel %vm459_vm3, %v3728_v32, %v2876_v47  ;;  %v517_v5 = vmul.f32 1.442695, %v488_v58 }
 0x114   :  { %v3436_v35 = vpop.eup %3435  ;;  %3451 = vpow2.f32 %v521_v38  ;;  %v537_v19 = vmul.f32 1.442695, %v498_v63  ;;  %v531_v48 = vmul.f32 1.442695, %v495_v29  ;;  %v3358_v63 = vld [vmem:[#allocation2 + $0x104] ss:$40 sps:$4 sm:$0xff]  }
 0x115   :  { %v2878_v40 = vadd.f32 -1.0, %v3436_v35  ;;  %v560_v60 = vsel %vm460_vm4, %v3731_v37, %v2877_v39  ;;  %3453 = vpow2.f32 %v529_v44  ;;  %v496_v37 = vmin.f32 %v3787_v56, 0.0  ;;  %v3344_v44 = vld [vmem:[#allocation2 + $0x1a0] ss:$40 sps:$4 sm:$0xff]  }
 0x116   :  { %v3438_v46 = vpop.eup %3437  ;;  %3455 = vpow2.f32 %v525_v55  ;;  %v3350_v55 = vld [vmem:[#allocation2 + $0x150] ss:$40 sps:$4 sm:$0xff]   ;;  %vm468_vm13 = vcmp.gt.f32.partialorder %v3781_v45, 0.0  ;;  %vm471_vm3 = vcmp.gt.f32.partialorder %v3772_v31, 0.0  ;;  %vm478_vm4 = vcmp.gt.f32.partialorder %v3785_v53, 0.0 }
 0x117   :  { %v2879_v54 = vadd.f32 -1.0, %v3438_v46  ;;  %v561_v57 = vsel %vm461_vm5, %v3735_v41, %v2878_v40  ;;  %v527_v41 = vmul.f32 1.442695, %v493_v50  ;;  %3457 = vpow2.f32 %v517_v5  ;;  %v3347_v46 = vld [vmem:[#allocation2 + $0x1a8] ss:$40 sps:$4 sm:$0xff]  }
 0x118   :  { %v3440_v8 = vpop.eup %3439  ;;  %v3804_v10 = vpack.c.bf16 %v561_v57, %v559_v3  ;;  %v533_v25 = vmul.f32 1.442695, %v496_v37  ;;  %v3355_v50 = vld [vmem:[#allocation2 + $0x15c] ss:$40 sps:$4 sm:$0xff]   ;;  %v3353_v57 = vld [vmem:[#allocation2 + $0x158] ss:$40 sps:$4 sm:$0xff]  }
 0x119   :  { %v562_v61 = vsel %vm462_vm6, %v3739_v51, %v2879_v54  ;;  %v3808_v51 = vadd.f32 %v437_v43, %v3754_v6  ;;  %v3338_v6 = vld [vmem:[#allocation2 + $0x1f0] ss:$40 sps:$4 sm:$0xff]   ;;  %3459 = vpow2.f32 %v527_v41  ;;  %v2880_v28 = vadd.f32 -1.0, %v3440_v8 }
 0x11a   :  { %v3802_v4 = vpack.c.bf16 %v562_v61, %v560_v60  ;;  %v3442_v13 = vpop.eup %3441  ;;  %3461 = vpow2.f32 %v523_v14  ;;  %vm476_vm5 = vcmp.gt.f32.partialorder %v3787_v56, 0.0 }
 0x11b   :  { %v2881_v24 = vadd.f32 -1.0, %v3442_v13  ;;  %v497_v26 = vmin.f32 %v3808_v51, 0.0  ;;  %3463 = vpow2.f32 %v537_v19  ;;  %v563_v39 = vsel %vm463_vm8, %v3741_v52, %v2880_v28 }
 0x11c   :  { %3006 = vmatprep.mubr.msk.bf16.mxu0 %vm1249_vm2, %v3802_v4  ;;  %3011 = vmatprep.mubr.msk.bf16.mxu1 %vm1249_vm2, %v3802_v4  ;;  %v3444_v32 = vpop.eup %3443  ;;  %3465 = vpow2.f32 %v533_v25  ;;  %v3365_v25 = vld [vmem:[#allocation2 + $0xb8] ss:$40 sps:$4 sm:$0xff]   ;;  %vm477_vm6 = vcmp.gt.f32.partialorder %v3808_v51, 0.0 }
 0x11d   :  { %1298 = vmatmul.mubr.bf16.vlgmr.msra.gmra.mxu0 %v3804_v10  ;;  %1381 = vmatmul.mubr.bf16.vlgmr.msra.gmra.mxu1 %v3804_v10  ;;  %v2882_v20 = vadd.f32 -1.0, %v3444_v32  ;;  %v564_v36 = vsel %vm464_vm9, %v3747_v62, %v2881_v24  ;;  %v535_v40 = vmul.f32 1.442695, %v497_v26  ;;  %v3359_v32 = vld [vmem:[#allocation2 + $0x108] ss:$40 sps:$4 sm:$0xff]  }
 0x11e   :  { %1432 = vmatpush1.bf16.msra.mxu0 %v3332_v0  ;;  %1515 = vmatpush1.bf16.msra.mxu1 %v3335_v7  ;;  %v3446_v27 = vpop.eup %3445  ;;  %v3361_v0 = vld [vmem:[#allocation2 + $0x10c] ss:$40 sps:$4 sm:$0xff]  }
 0x11f   :  { %1433 = vmatprep.subr.bf16.mxu0 %v3340_v11  ;;  %1516 = vmatprep.subr.bf16.mxu1 %v3343_v12  ;;  %v2883_v30 = vadd.f32 -1.0, %v3446_v27  ;;  %v3448_v34 = vpop.eup %3447  ;;  %v565_v35 = vsel %vm465_vm7, %v3751_v2, %v2882_v20  ;;  %3467 = vpow2.f32 %v535_v40  ;;  %v3370_v26 = vld [vmem:[#allocation2 + $0x64] ss:$40 sps:$4 sm:$0xff]   ;;  %vm475_vm7 = vcmp.gt.f32.partialorder %v3815_v16, 0.0 }
 0x120   :  { %v3450_v42 = vpop.eup %3449  ;;  %v3831_v47 = vpack.c.bf16 %v565_v35, %v563_v39  ;;  %v2886_v60 = vadd.f32 -1.0, %v3448_v34  ;;  %3469 = vpow2.f32 %v531_v48  ;;  %v3368_v35 = vld [vmem:[#allocation2 + $0x60] ss:$40 sps:$4 sm:$0xff]   ;;  %v3376_v39 = vld [vmem:[#allocation2 + $0x14] ss:$40 sps:$4 sm:$0xff]  }
 0x121   :  { %v566_v38 = vsel %vm466_vm10, %v3762_v17, %v2883_v30  ;;  %v3452_v2 = vpop.eup %3451  ;;  %v2884_v17 = vadd.f32 -1.0, %v3450_v42  ;;  %v3385_v48 = vld [vmem:[#allocation2 + $0x33c] ss:$40 sps:$4 sm:$0xff]  }
 0x122   :  { %1434 = vmatpush1.bf16.msra.mxu0 %v3338_v6  ;;  %1517 = vmatpush1.bf16.msra.mxu1 %v3341_v22  ;;  %v3829_v43 = vpack.c.bf16 %v566_v38, %v564_v36  ;;  %v3454_v62 = vpop.eup %3453  ;;  %v2887_v54 = vadd.f32 -1.0, %v3452_v2  ;;  %v569_v12 = vsel %vm469_vm14, %v3749_v1, %v2886_v60  ;;  %v3364_v1 = vld [vmem:[#allocation2 + $0xb4] ss:$40 sps:$4 sm:$0xff]   ;;  %v3371_v36 = vld [vmem:[#allocation2 + $0x68] ss:$40 sps:$4 sm:$0xff]  }
 0x123   :  { %1435 = vmatprep.subr.bf16.mxu0 %v3346_v23  ;;  %1518 = vmatprep.subr.bf16.mxu1 %v3349_v59  ;;  %v3456_v52 = vpop.eup %3455  ;;  %v2891_v61 = vadd.f32 -1.0, %v3454_v62  ;;  %v567_v5 = vsel %vm467_vm11, %v3764_v18, %v2884_v17  ;;  %v3356_v18 = vld [vmem:[#allocation2 + $0x100] ss:$40 sps:$4 sm:$0xff]   ;;  %v3373_v59 = vld [vmem:[#allocation2 + $0x6c] ss:$40 sps:$4 sm:$0xff]  }
 0x124   :  { %3007 = vmatprep.mubr.msk.bf16.mxu0 %vm1249_vm2, %v3829_v43  ;;  %3012 = vmatprep.mubr.msk.bf16.mxu1 %vm1249_vm2, %v3829_v43  ;;  %v3458_v58 = vpop.eup %3457  ;;  %v2889_v41 = vadd.f32 -1.0, %v3456_v52  ;;  %v570_v8 = vsel %vm470_vm12, %v3757_v9, %v2887_v54  ;;  %v3852_v9 = vpack.c.bf16 %v569_v12, %v567_v5  ;;  %v3377_v2 = vld [vmem:[#allocation2 + $0x18] ss:$40 sps:$4 sm:$0xff]   ;;  %v3388_v54 = vld [vmem:[#allocation2 + $0x2e4] ss:$40 sps:$4 sm:$0xff]  }
 0x125   :  { %1308 = vmatmul.mubr.bf16.gmra.mxu0 %v3831_v47  ;;  %1391 = vmatmul.mubr.bf16.gmra.mxu1 %v3831_v47  ;;  %v2885_v3 = vadd.f32 -1.0, %v3458_v58  ;;  %v574_v13 = vsel %vm474_vm15, %v3760_v15, %v2891_v61  ;;  %v3367_v15 = vld [vmem:[#allocation2 + $0xbc] ss:$40 sps:$4 sm:$0xff]   ;;  %v3380_v62 = vld [vmem:[#allocation2 + $0x330] ss:$40 sps:$4 sm:$0xff]  }
 0x126   :  { %1436 = vmatpush1.bf16.msra.mxu0 %v3344_v44  ;;  %1519 = vmatpush1.bf16.msra.mxu1 %v3347_v46  ;;  %v3460_v7 = vpop.eup %3459  ;;  %v3379_v44 = vld [vmem:[#allocation2 + $0x1c] ss:$40 sps:$4 sm:$0xff]   ;;  %v3383_v17 = vld [vmem:[#allocation2 + $0x338] ss:$40 sps:$4 sm:$0xff]  }
 0x127   :  { %1437 = vmatprep.subr.bf16.mxu0 %v3352_v49  ;;  %1520 = vmatprep.subr.bf16.mxu1 %v3355_v50  ;;  %v568_v37 = vsel %vm468_vm13, %v3781_v45, %v2885_v3  ;;  %v3462_v11 = vpop.eup %3461  ;;  %v572_v45 = vsel %vm472_vm0, %v3766_v21, %v2889_v41  ;;  %v2890_v6 = vadd.f32 -1.0, %v3460_v7  ;;  %v3362_v21 = vld [vmem:[#allocation2 + $0xb0] ss:$40 sps:$4 sm:$0xff]   ;;  %v3397_v58 = vld [vmem:[#allocation2 + $0x29c] ss:$40 sps:$4 sm:$0xff]  }
 0x128   :  { %v3849_v14 = vpack.c.bf16 %v570_v8, %v568_v37  ;;  %v3464_v19 = vpop.eup %3463  ;;  %v3859_v22 = vpack.c.bf16 %v574_v13, %v572_v45  ;;  %v2888_v23 = vadd.f32 -1.0, %v3462_v11  ;;  %v3392_v60 = vld [vmem:[#allocation2 + $0x290] ss:$40 sps:$4 sm:$0xff]   ;;  %v3403_v3 = vld [vmem:[#allocation2 + $0x204] ss:$40 sps:$4 sm:$0xff]  }
 0x129   :  { %v3466_v20 = vpop.eup %3465  ;;  %v2895_v24 = vadd.f32 -1.0, %v3464_v19  ;;  %v573_v27 = vsel %vm473_vm1, %v3774_v33, %v2890_v6  ;;  %v3395_v61 = vld [vmem:[#allocation2 + $0x298] ss:$40 sps:$4 sm:$0xff]   ;;  %v3406_v5 = vld [vmem:[#allocation2 + $0x1b4] ss:$40 sps:$4 sm:$0xff]  }
 0x12a   :  { %1438 = vmatpush1.bf16.msra.mxu0 %v3350_v55  ;;  %1521 = vmatpush1.bf16.msra.mxu1 %v3353_v57  ;;  %v2893_v28 = vadd.f32 -1.0, %v3466_v20  ;;  %v571_v30 = vsel %vm471_vm3, %v3772_v31, %v2888_v23  ;;  %v3391_v55 = vld [vmem:[#allocation2 + $0x2ec] ss:$40 sps:$4 sm:$0xff]   ;;  %v3389_v57 = vld [vmem:[#allocation2 + $0x2e8] ss:$40 sps:$4 sm:$0xff]  }
 0x12b   :  { %1439 = vmatprep.subr.bf16.mxu0 %v3358_v63  ;;  %1522 = vmatprep.subr.bf16.mxu1 %v3361_v0  ;;  %v578_v34 = vsel %vm478_vm4, %v3785_v53, %v2895_v24  ;;  %v3873_v40 = vpack.c.bf16 %v573_v27, %v571_v30  ;;  %v3374_v53 = vld [vmem:[#allocation2 + $0x10] ss:$40 sps:$4 sm:$0xff]   ;;  %v3400_v63 = vld [vmem:[#allocation2 + $0x254] ss:$40 sps:$4 sm:$0xff]   ;;  %v3401_v41 = vld [vmem:[#allocation2 + $0x200] ss:$40 sps:$4 sm:$0xff]  }
 0x12c   :  { %3008 = vmatprep.mubr.msk.bf16.mxu0 %vm1249_vm2, %v3849_v14  ;;  %3013 = vmatprep.mubr.msk.bf16.mxu1 %vm1249_vm2, %v3849_v14  ;;  %v3468_v29 = vpop.eup %3467  ;;  %v576_v33 = vsel %vm476_vm5, %v3787_v56, %v2893_v28  ;;  %v3382_v56 = vld [vmem:[#allocation2 + $0x334] ss:$40 sps:$4 sm:$0xff]   ;;  %v3398_v0 = vld [vmem:[#allocation2 + $0x250] ss:$40 sps:$4 sm:$0xff]   ;;  %v3409_v8 = vld [vmem:[#allocation2 + $0x164] ss:$40 sps:$4 sm:$0xff]  }
 0x12d   :  { %1318 = vmatmul.mubr.bf16.gmra.mxu0 %v3852_v9  ;;  %1401 = vmatmul.mubr.bf16.gmra.mxu1 %v3852_v9  ;;  %v3470_v38 = vpop.eup %3469  ;;  %v2894_v42 = vadd.f32 -1.0, %v3468_v29  ;;  %v3877_v46 = vpack.c.bf16 %v578_v34, %v576_v33  ;;  %v3404_v7 = vld [vmem:[#allocation2 + $0x1b0] ss:$40 sps:$4 sm:$0xff]   ;;  %v3407_v37 = vld [vmem:[#allocation2 + $0x160] ss:$40 sps:$4 sm:$0xff]  }
 0x12e   :  { %1440 = vmatpush1.bf16.msra.mxu0 %v3356_v18  ;;  %1523 = vmatpush1.bf16.msra.mxu1 %v3359_v32  ;;  %v2892_v31 = vadd.f32 -1.0, %v3470_v38  ;;  %v3412_v11 = vld [vmem:[#allocation2 + $0x114] ss:$40 sps:$4 sm:$0xff]   ;;  %v3410_v12 = vld [vmem:[#allocation2 + $0x110] ss:$40 sps:$4 sm:$0xff]  }
 0x12f   :  { %3009 = vmatprep.mubr.msk.bf16.mxu0 %vm1249_vm2, %v3859_v22  ;;  %3014 = vmatprep.mubr.msk.bf16.mxu1 %vm1249_vm2, %v3859_v22  ;;  %v577_v49 = vsel %vm477_vm6, %v3808_v51, %v2894_v42  ;;  %v3386_v51 = vld [vmem:[#allocation2 + $0x2e0] ss:$40 sps:$4 sm:$0xff]   ;;  %v3415_v13 = vld [vmem:[#allocation2 + $0xc4] ss:$40 sps:$4 sm:$0xff]   ;;  %v3418_v32 = vld [vmem:[#allocation2 + $0x74] ss:$40 sps:$4 sm:$0xff]  }
 0x130   :  { %1441 = vmatprep.subr.bf16.mxu0 %v3364_v1  ;;  %1524 = vmatprep.subr.bf16.mxu1 %v3367_v15  ;;  %v575_v50 = vsel %vm475_vm7, %v3815_v16, %v2892_v31  ;;  %v3394_v16 = vld [vmem:[#allocation2 + $0x294] ss:$40 sps:$4 sm:$0xff]   ;;  %v3413_v18 = vld [vmem:[#allocation2 + $0xc0] ss:$40 sps:$4 sm:$0xff]   ;;  %v3416_v19 = vld [vmem:[#allocation2 + $0x70] ss:$40 sps:$4 sm:$0xff]  }
 0x131   :  { %v3889_v52 = vpack.c.bf16 %v577_v49, %v575_v50  ;;  %v3421_v45 = vld [vmem:[#allocation2 + $0x24] ss:$40 sps:$4 sm:$0xff]   ;;  %v3419_v6 = vld [vmem:[#allocation2 + $0x20] ss:$40 sps:$4 sm:$0xff]   ;;  %v3427_v20 = vld [vmem:[#allocation2 + $0x2f4] ss:$40 sps:$4 sm:$0xff]  }
 0x132   :  { %1442 = vmatpush1.bf16.msra.mxu0 %v3362_v21  ;;  %1525 = vmatpush1.bf16.msra.mxu1 %v3365_v25  ;;  %v3424_v1 = vld [vmem:[#allocation2 + $0x344] ss:$40 sps:$4 sm:$0xff]   ;;  %v3422_v15 = vld [vmem:[#allocation2 + $0x340] ss:$40 sps:$4 sm:$0xff]   ;;  %v3425_v23 = vld [vmem:[#allocation2 + $0x2f0] ss:$40 sps:$4 sm:$0xff]  }
 0x133   :  { %1443 = vmatprep.subr.bf16.mxu0 %v3370_v26  ;;  %1526 = vmatprep.subr.bf16.mxu1 %v3373_v59  ;;  %v3430_v24 = vld [vmem:[#allocation2 + $0x2a4] ss:$40 sps:$4 sm:$0xff]   ;;  %v3428_v21 = vld [vmem:[#allocation2 + $0x2a0] ss:$40 sps:$4 sm:$0xff]  }
 0x135   :  { %1328 = vmatmul.mubr.bf16.gmra.mxu0 %v3873_v40  ;;  %1411 = vmatmul.mubr.bf16.gmra.mxu1 %v3873_v40 }
 0x136   :  { %1444 = vmatpush1.bf16.msra.mxu0 %v3368_v35  ;;  %1527 = vmatpush1.bf16.msra.mxu1 %v3371_v36 }
 0x137   :  { %3010 = vmatprep.mubr.msk.bf16.mxu0 %vm1249_vm2, %v3877_v46  ;;  %3015 = vmatprep.mubr.msk.bf16.mxu1 %vm1249_vm2, %v3877_v46 }
 0x138   :  { %1445 = vmatprep.subr.bf16.mxu0 %v3376_v39  ;;  %1528 = vmatprep.subr.bf16.mxu1 %v3379_v44 }
 0x13a   :  { %1446 = vmatpush1.bf16.msra.mxu0 %v3374_v53  ;;  %1529 = vmatpush1.bf16.msra.mxu1 %v3377_v2 }
 0x13b   :  { %1457 = vmatprep.subr.bf16.mxu0 %v3382_v56  ;;  %1540 = vmatprep.subr.bf16.mxu1 %v3385_v48 }
 0x13d   :  { %1338 = vmatmul.mubr.bf16.gmra.mxu0 %v3889_v52  ;;  %1421 = vmatmul.mubr.bf16.gmra.mxu1 %v3889_v52 }
 0x13e   :  { %1458 = vmatpush2.bf16.msra.mxu0 %v3380_v62  ;;  %1541 = vmatpush2.bf16.msra.mxu1 %v3383_v17 }
 0x13f   :  { %3016 = vmatprep.mubr.msk.bf16.mxu0 %vm1249_vm2, %v3802_v4  ;;  %3021 = vmatprep.mubr.msk.bf16.mxu1 %vm1249_vm2, %v3802_v4 }
 0x140   :  { %1459 = vmatprep.subr.bf16.mxu0 %v3388_v54  ;;  %1542 = vmatprep.subr.bf16.mxu1 %v3391_v55  ;;  %v1725_v55 = vld [vmem:[%s4346_s4 + $0x168] sm:$0xff] }
 0x142   :  { %1460 = vmatpush2.bf16.msra.mxu0 %v3386_v51  ;;  %1543 = vmatpush2.bf16.msra.mxu1 %v3389_v57 }
 0x143   :  { %1461 = vmatprep.subr.bf16.mxu0 %v3394_v16  ;;  %1544 = vmatprep.subr.bf16.mxu1 %v3397_v58  ;;  %v1720_v16 = vld [vmem:[%s4346_s4 + $0x140] sm:$0xff]  ;;  %v1821_v58 = vunpack.c.h.bf16 %v1725_v55 }
 0x146   :  { %1462 = vmatpush2.bf16.msra.mxu0 %v3392_v60  ;;  %1545 = vmatpush2.bf16.msra.mxu1 %v3395_v61  ;;  %v1820_v61 = vunpack.c.l.bf16 %v1725_v55 }
 0x147   :  { %1597 = vmatprep.subr.bf16.mxu0 %v3400_v63  ;;  %v1715_v63 = vld [vmem:[%s4346_s4 + $0x118] sm:$0xff] }
 0x149   :  { %1464 = vmatmul.mubr.bf16.vlgmr.msra.gmra.mxu0 %v3804_v10  ;;  %1547 = vmatmul.mubr.bf16.vlgmr.msra.gmra.mxu1 %v3804_v10 }
 0x14a   :  { %3017 = vmatprep.mubr.msk.bf16.mxu0 %vm1249_vm2, %v3829_v43  ;;  %3022 = vmatprep.mubr.msk.bf16.mxu1 %vm1249_vm2, %v3829_v43 }
 0x14b   :  { %1598 = vmatpush1.bf16.msra.mxu0 %v3398_v0  ;;  %v1811_v0 = vunpack.c.h.bf16 %v1720_v16 }
 0x14c   :  { %1599 = vmatprep.subr.bf16.mxu0 %v3403_v3  ;;  %v1810_v3 = vunpack.c.l.bf16 %v1720_v16 }
 0x14f   :  { %1600 = vmatpush1.bf16.msra.mxu0 %v3401_v41 }
 0x150   :  { %1601 = vmatprep.subr.bf16.mxu0 %v3406_v5 }
 0x151   :  { %1474 = vmatmul.mubr.bf16.gmra.mxu0 %v3831_v47  ;;  %1557 = vmatmul.mubr.bf16.gmra.mxu1 %v3831_v47 }
 0x152   :  { %3018 = vmatprep.mubr.msk.bf16.mxu0 %vm1249_vm2, %v3849_v14  ;;  %3023 = vmatprep.mubr.msk.bf16.mxu1 %vm1249_vm2, %v3849_v14 }
 0x153   :  { %1602 = vmatpush1.bf16.msra.mxu0 %v3404_v7  ;;  %v1710_v7 = vld [vmem:[%s4346_s4 + $0xf0] sm:$0xff] }
 0x154   :  { %1603 = vmatprep.subr.bf16.mxu0 %v3409_v8  ;;  %v1801_v8 = vunpack.c.h.bf16 %v1715_v63 }
 0x157   :  { %1604 = vmatpush1.bf16.msra.mxu0 %v3407_v37 }
 0x158   :  { %1605 = vmatprep.subr.bf16.mxu0 %v3412_v11  ;;  %v1800_v11 = vunpack.c.l.bf16 %v1715_v63 }
 0x159   :  { %1484 = vmatmul.mubr.bf16.gmra.mxu0 %v3852_v9  ;;  %1567 = vmatmul.mubr.bf16.gmra.mxu1 %v3852_v9 }
 0x15a   :  { %3019 = vmatprep.mubr.msk.bf16.mxu0 %vm1249_vm2, %v3859_v22  ;;  %3024 = vmatprep.mubr.msk.bf16.mxu1 %vm1249_vm2, %v3859_v22 }
 0x15b   :  { %1606 = vmatpush1.bf16.msra.mxu0 %v3410_v12 }
 0x15c   :  { %1607 = vmatprep.subr.bf16.mxu0 %v3415_v13  ;;  %v1705_v13 = vld [vmem:[%s4346_s4 + $0xc8] sm:$0xff] }
 0x15f   :  { %1608 = vmatpush1.bf16.msra.mxu0 %v3413_v18  ;;  %v1791_v18 = vunpack.c.h.bf16 %v1710_v7 }
 0x160   :  { %1609 = vmatprep.subr.bf16.mxu0 %v3418_v32 }
 0x161   :  { %1494 = vmatmul.mubr.bf16.gmra.mxu0 %v3873_v40  ;;  %1577 = vmatmul.mubr.bf16.gmra.mxu1 %v3873_v40 }
 0x162   :  { %3020 = vmatprep.mubr.msk.bf16.mxu0 %vm1249_vm2, %v3877_v46  ;;  %3025 = vmatprep.mubr.msk.bf16.mxu1 %vm1249_vm2, %v3877_v46 }
 0x163   :  { %1610 = vmatpush1.bf16.msra.mxu0 %v3416_v19  ;;  %v1790_v19 = vunpack.c.l.bf16 %v1710_v7 }
 0x164   :  { %1611 = vmatprep.subr.bf16.mxu0 %v3421_v45 }
 0x167   :  { %1612 = vmatpush1.bf16.msra.mxu0 %v3419_v6 }
 0x168   :  { %1623 = vmatprep.subr.bf16.mxu0 %v3424_v1  ;;  %v1700_v1 = vld [vmem:[%s4346_s4 + $0xa0] sm:$0xff] }
 0x169   :  { %1504 = vmatmul.mubr.bf16.gmra.mxu0 %v3889_v52  ;;  %1587 = vmatmul.mubr.bf16.gmra.mxu1 %v3889_v52 }
 0x16a   :  { %3026 = vmatprep.mubr.msk.bf16.mxu0 %vm1249_vm2, %v3802_v4  ;;  %v4351_v4 = vmov 0.0  }
 0x16b   :  { %1624 = vmatpush2.bf16.msra.mxu0 %v3422_v15  ;;  %1999 = vmatprep.mubr.f32.mxu1 %v4351_v4  ;;  %v1781_v15 = vunpack.c.h.bf16 %v1705_v13 }
 0x16c   :  { %1625 = vmatprep.subr.bf16.mxu0 %v3427_v20 }
 0x16f   :  { %1626 = vmatpush2.bf16.msra.mxu0 %v3425_v23  ;;  %v1780_v23 = vunpack.c.l.bf16 %v1705_v13 }
 0x170   :  { %1627 = vmatprep.subr.bf16.mxu0 %v3430_v24 }
 0x173   :  { %1628 = vmatpush2.bf16.msra.mxu0 %v3428_v21 }
 0x176   :  { %1630 = vmatmul.mubr.bf16.vlgmr.msra.gmra.mxu0 %v3804_v10 }
 0x177   :  { %3027 = vmatprep.mubr.msk.bf16.mxu0 %vm1249_vm2, %v3829_v43 }
 0x17e   :  { %1640 = vmatmul.mubr.bf16.gmra.mxu0 %v3831_v47 }
 0x17f   :  { %3028 = vmatprep.mubr.msk.bf16.mxu0 %vm1249_vm2, %v3849_v14 }
 0x186   :  { %1650 = vmatmul.mubr.bf16.gmra.mxu0 %v3852_v9 }
 0x187   :  { %3029 = vmatprep.mubr.msk.bf16.mxu0 %vm1249_vm2, %v3859_v22 }
 0x18e   :  { %1660 = vmatmul.mubr.bf16.gmra.mxu0 %v3873_v40 }
 0x18f   :  { %3030 = vmatprep.mubr.msk.bf16.mxu0 %vm1249_vm2, %v3877_v46  ;;  %vm1931_vm2 = vcmask 654336  }
 0x196   :  { %1670 = vmatmul.mubr.bf16.gmra.mxu0 %v3889_v52 }
 0x197   :  { %2212 = vmatprep.mubr.f32.mxu0 %v4351_v4 }
 0x1dd   :  { %v3940_v10 = vpop.f32.mrf.mxu0  ;;  %v3942_v43 = vpop.f32.mrf.mxu1 }
 0x1df   :  { %v3944_v47 = vpop.f32.mrf.mxu0  ;;  %v3946_v14 = vpop.f32.mrf.mxu1 }
 0x1e1   :  { %v3948_v9 = vpop.f32.mrf.mxu0  ;;  %v3950_v22 = vpop.f32.mrf.mxu1 }
 0x1e3   :  { %v3952_v25 = vpop.f32.mrf.mxu0  ;;  %v3954_v26 = vpop.f32.mrf.mxu1 }
 0x1e5   :  { %v3956_v59 = vpop.f32.mrf.mxu0  ;;  %v3958_v27 = vpop.f32.mrf.mxu1 }
 0x1e7   :  { %v3960_v28 = vpop.f32.mrf.mxu0  ;;  %v3962_v29 = vpop.f32.mrf.mxu1 }
 0x1e9   :  { %v3964_v30 = vpop.f32.mrf.mxu0  ;;  %v3966_v34 = vpop.f32.mrf.mxu1 }
 0x1eb   :  { %v3968_v35 = vpop.f32.mrf.mxu0  ;;  %v3970_v36 = vpop.f32.mrf.mxu1 }
 0x1ed   :  { %v3972_v38 = vpop.f32.mrf.mxu0  ;;  %v3974_v40 = vpop.f32.mrf.mxu1 }
 0x1ef   :  { %v3976_v33 = vpop.f32.mrf.mxu0  ;;  %v3978_v42 = vpop.f32.mrf.mxu1 }
 0x1f1   :  { %v1323_v39 = vpop.f32.mrf.mxu0  ;;  %v3980_v44 = vpop.f32.mrf.mxu1 }
 0x1f3   :  { %v1325_v46 = vpop.f32.mrf.mxu0  ;;  %v3982_v31 = vpop.f32.mrf.mxu1 }
 0x1f5   :  { %v1329_v53 = vpop.f32.mrf.mxu0  ;;  %v3984_v2 = vpop.f32.mrf.mxu1 }
 0x1f7   :  { %v1331_v56 = vpop.f32.mrf.mxu0  ;;  %v3986_v48 = vpop.f32.mrf.mxu1 }
 0x1f8   :  { %v1891_v16 = vmul.f32 %v1791_v18, %v1331_v56 }
 0x1f9   :  { %v1333_v49 = vpop.f32.mrf.mxu0  ;;  %v3988_v50 = vpop.f32.mrf.mxu1 }
 0x1fa   :  { %v1900_v24 = vmul.f32 %v1800_v11, %v1333_v49  ;;  %v1690_v49 = vld [vmem:[%s4346_s4 + $0x50] sm:$0xff] }
 0x1fb   :  { %v1335_v62 = vpop.f32.mrf.mxu0  ;;  %v3990_v17 = vpop.f32.mrf.mxu1  ;;  %v1750_v11 = vunpack.c.l.bf16 %v1690_v49 }
 0x1fc   :  { %v1901_v20 = vmul.f32 %v1801_v8, %v1335_v62  ;;  %v1751_v8 = vunpack.c.h.bf16 %v1690_v49 }
 0x1fd   :  { %v1339_v52 = vpop.f32.mrf.mxu0  ;;  %v3992_v54 = vpop.f32.mrf.mxu1 }
 0x1fe   :  { %v1910_v45 = vmul.f32 %v1810_v3, %v1339_v52  ;;  %v1695_v52 = vld [vmem:[%s4346_s4 + $0x78] sm:$0xff] }
 0x1ff   :  { %v1341_v51 = vpop.f32.mrf.mxu0  ;;  %v3997_v57 = vpop.f32.mrf.mxu1  ;;  %v1761_v63 = vunpack.c.h.bf16 %v1695_v52  ;;  %v1760_v3 = vunpack.c.l.bf16 %v1695_v52 }
 0x200   :  { %v1911_v32 = vmul.f32 %v1811_v0, %v1341_v51  ;;  %v1771_v51 = vunpack.c.h.bf16 %v1700_v1  ;;  %v1881_v0 = vmul.f32 %v1781_v15, %v1325_v46  ;;  %v1851_v15 = vmul.f32 %v1751_v8, %v3960_v28 }
 0x201   :  { %v1343_v60 = vpop.f32.mrf.mxu0  ;;  %v4005_v41 = vpop.f32.mrf.mxu1 }
 0x202   :  { %v1920_v12 = vmul.f32 %v1820_v61, %v1343_v60  ;;  %v1890_v60 = vmul.f32 %v1790_v19, %v1329_v53  ;;  %v1685_v53 = vld [vmem:[%s4346_s4 + $0x28] sm:$0xff] }
 0x203   :  { %v1345_v5 = vpop.f32.mrf.mxu0  ;;  %v4013_v6 = vpop.f32.mrf.mxu1  ;;  %v1741_v18 = vunpack.c.h.bf16 %v1685_v53  ;;  %v1740_v19 = vunpack.c.l.bf16 %v1685_v53  ;;  %v4084_v53 = vld [vmem:[%s4348_s6] sm:$0x3] }
 0x204   :  { %v1921_v37 = vmul.f32 %v1821_v58, %v1345_v5  ;;  %v1770_v58 = vunpack.c.l.bf16 %v1700_v1  ;;  %v1880_v5 = vmul.f32 %v1780_v23, %v1323_v39  ;;  %v1680_v39 = vld [vmem:[%s4346_s4] sm:$0xff]  ;;  %4356 = vst [vmem:[#allocation13_spill] sm:$0xff] %v4084_v53 }
 0x205   :  { %v1730_v23 = vunpack.c.l.bf16 %v1680_v39 }
 0x206   :  { %1947 = vmatprep.subr.mxu1 %v1921_v37  ;;  %v1871_v37 = vmul.f32 %v1771_v51, %v3976_v33  ;;  %v1860_v33 = vmul.f32 %v1760_v3, %v3964_v30  ;;  %v1841_v30 = vmul.f32 %v1741_v18, %v3952_v25  ;;  %v1721_v51 = vld [vmem:[%s4346_s4 + $0x148] sm:$0xff]  ;;  %v1716_v25 = vld [vmem:[%s4346_s4 + $0x120] sm:$0xff]  ;;  %v1706_v18 = vld [vmem:[%s4346_s4 + $0xd0] sm:$0xff] }
 0x207   :  { %1948 = vmatpush1.msra.mxu1 %v1920_v12  ;;  %v1870_v12 = vmul.f32 %v1770_v58, %v3972_v38  ;;  %v1731_v38 = vunpack.c.h.bf16 %v1680_v39  ;;  %v1812_v3 = vunpack.c.l.bf16 %v1721_v51  ;;  %v1803_v8 = vunpack.c.h.bf16 %v1716_v25 }
 0x208   :  { %1949 = vmatprep.subr.mxu1 %v1911_v32  ;;  %v1861_v32 = vmul.f32 %v1761_v63, %v3968_v35  ;;  %v1850_v35 = vmul.f32 %v1750_v11, %v3956_v59  ;;  %v1813_v63 = vunpack.c.h.bf16 %v1721_v51  ;;  %v1696_v51 = vld [vmem:[%s4346_s4 + $0x80] sm:$0xff] }
 0x209   :  { %v4018_v21 = vpop.f32.mrf.mxu0  ;;  %v4020_v55 = vpop.f32.mrf.mxu1  ;;  %1950 = vmatpush1.msra.mxu1 %v1910_v45  ;;  %v1831_v59 = vmul.f32 %v1731_v38, %v3944_v47  ;;  %v1711_v47 = vld [vmem:[%s4346_s4 + $0xf8] sm:$0xff] }
 0x20a   :  { %4354 = vst [vmem:[#allocation11_spill] sm:$0xff] %v4018_v21  ;;  %4355 = vst [vmem:[#allocation12_spill] sm:$0xff] %v4020_v55  ;;  %1951 = vmatprep.subr.mxu1 %v1901_v20  ;;  %v1726_v20 = vld [vmem:[%s4346_s4 + $0x170] sm:$0xff] }
 0x20b   :  { %v4025_v61 = vpop.f32.mrf.mxu0  ;;  %v4027_v62 = vpop.f32.mrf.mxu1  ;;  %1952 = vmatpush1.msra.mxu1 %v1900_v24  ;;  %v1823_v28 = vunpack.c.h.bf16 %v1726_v20  ;;  %v1822_v58 = vunpack.c.l.bf16 %v1726_v20  ;;  %v1783_v20 = vunpack.c.h.bf16 %v1706_v18 }
 0x20c   :  { %1953 = vmatprep.subr.mxu1 %v1891_v16  ;;  %v1840_v16 = vmul.f32 %v1740_v19, %v3948_v9  ;;  %v1913_v19 = vmul.f32 %v1813_v63, %v3997_v57  ;;  %v1903_v57 = vmul.f32 %v1803_v8, %v3990_v17  ;;  %v1763_v63 = vunpack.c.h.bf16 %v1696_v51 }
 0x20d   :  { %v4032_v7 = vpop.f32.mrf.mxu0  ;;  %v4034_v56 = vpop.f32.mrf.mxu1  ;;  %1954 = vmatpush1.msra.mxu1 %v1890_v60  ;;  %v1922_v11 = vmul.f32 %v1822_v58, %v4005_v41 }
 0x20e   :  { %1955 = vmatprep.subr.mxu1 %v1881_v0  ;;  %v1830_v0 = vmul.f32 %v1730_v23, %v3940_v10  ;;  %v1802_v10 = vunpack.c.l.bf16 %v1716_v25  ;;  %v1782_v23 = vunpack.c.l.bf16 %v1706_v18 }
 0x20f   :  { %v4041_v46 = vpop.f32.mrf.mxu0  ;;  %v4043_v13 = vpop.f32.mrf.mxu1  ;;  %1956 = vmatpush1.msra.mxu1 %v1880_v5 }
 0x210   :  { %1957 = vmatprep.subr.mxu1 %v1871_v37  ;;  %v1923_v37 = vmul.f32 %v1823_v28, %v4013_v6  ;;  %v1792_v6 = vunpack.c.l.bf16 %v1711_v47 }
 0x211   :  { %v4050_v45 = vpop.f32.mrf.mxu0  ;;  %v4052_v1 = vpop.f32.mrf.mxu1  ;;  %1958 = vmatpush1.msra.mxu1 %v1870_v12 }
 0x212   :  { %1959 = vmatprep.subr.mxu1 %v1861_v32  ;;  %v1793_v32 = vunpack.c.h.bf16 %v1711_v47  ;;  %v1892_v17 = vmul.f32 %v1792_v6, %v3984_v2  ;;  %v1686_v2 = vld [vmem:[%s4346_s4 + $0x30] sm:$0xff]  ;;  %v1863_v6 = vmul.f32 %v1763_v63, %v3970_v36 }
 0x213   :  { %v4059_v24 = vpop.f32.mrf.mxu0  ;;  %v4061_v52 = vpop.f32.mrf.mxu1  ;;  %1960 = vmatpush1.msra.mxu1 %v1860_v33  ;;  %v1912_v33 = vmul.f32 %v1812_v3, %v3992_v54  ;;  %v1762_v3 = vunpack.c.l.bf16 %v1696_v51 }
 0x214   :  { %1961 = vmatprep.subr.mxu1 %v1851_v15  ;;  %v1701_v15 = vld [vmem:[%s4346_s4 + $0xa8] sm:$0xff] }
 0x215   :  { %v4068_v60 = vpop.f32.mrf.mxu0  ;;  %v4070_v49 = vpop.f32.mrf.mxu1  ;;  %1962 = vmatpush1.msra.mxu1 %v1850_v35  ;;  %v1902_v35 = vmul.f32 %v1802_v10, %v3988_v50  ;;  %v1773_v28 = vunpack.c.h.bf16 %v1701_v15  ;;  %v1772_v58 = vunpack.c.l.bf16 %v1701_v15  ;;  %v1691_v50 = vld [vmem:[%s4346_s4 + $0x58] sm:$0xff] }
 0x216   :  { %1963 = vmatprep.subr.mxu1 %v1841_v30 }
 0x217   :  { %v4077_v5 = vpop.f32.mrf.mxu0  ;;  %v4079_v9 = vpop.f32.mrf.mxu1  ;;  %1964 = vmatpush1.msra.mxu1 %v1840_v16  ;;  %v1893_v16 = vmul.f32 %v1793_v32, %v3986_v48  ;;  %v1882_v48 = vmul.f32 %v1782_v23, %v3980_v44  ;;  %v1873_v10 = vmul.f32 %v1773_v28, %v3978_v42  ;;  %v1681_v44 = vld [vmem:[%s4346_s4 + $0x8] sm:$0xff]  ;;  %v1862_v42 = vmul.f32 %v1762_v3, %v3966_v34 }
 0x218   :  { %1965 = vmatprep.subr.mxu1 %v1831_v59  ;;  %v1732_v23 = vunpack.c.l.bf16 %v1681_v44 }
 0x219   :  { %v4091_v12 = vpop.f32.mrf.mxu0  ;;  %v4093_v39 = vpop.f32.mrf.mxu1  ;;  %1966 = vmatpush1.msra.mxu1 %v1830_v0  ;;  %v1883_v0 = vmul.f32 %v1783_v20, %v3982_v31  ;;  %v1872_v31 = vmul.f32 %v1772_v58, %v3974_v40  ;;  %v1733_v40 = vunpack.c.h.bf16 %v1681_v44 }
 0x21a   :  { %2018 = vmatprep.subr.mxu1 %v1923_v37  ;;  %3031 = vmatmul.mubr.msk.f32.vlgmr.msra.gmra.mxu1 %vm1931_vm2, %v4084_v53  ;;  %v1753_v37 = vunpack.c.h.bf16 %v1691_v50 }
 0x21b   :  { %v4102_v41 = vpop.f32.mrf.mxu0  ;;  %v4104_v38 = vpop.f32.mrf.mxu1  ;;  %2019 = vmatpush1.msra.mxu1 %v1922_v11  ;;  %2070 = vmatprep.mubr.f32.mxu1 %v4351_v4  ;;  %v1752_v11 = vunpack.c.l.bf16 %v1691_v50  ;;  %v1832_v50 = vmul.f32 %v1732_v23, %v3942_v43  ;;  %v1717_v43 = vld [vmem:[%s4346_s4 + $0x128] sm:$0xff] }
 0x21c   :  { %2020 = vmatprep.subr.mxu1 %v1913_v19  ;;  %v1743_v19 = vunpack.c.h.bf16 %v1686_v2  ;;  %v1805_v23 = vunpack.c.h.bf16 %v1717_v43 }
 0x21d   :  { %v4112_v30 = vpop.f32.mrf.mxu0  ;;  %v4114_v54 = vpop.f32.mrf.mxu1  ;;  %2021 = vmatpush1.msra.mxu1 %v1912_v33  ;;  %v1742_v33 = vunpack.c.l.bf16 %v1686_v2 }
 0x21e   :  { %2022 = vmatprep.subr.mxu1 %v1903_v57  ;;  %v1853_v57 = vmul.f32 %v1753_v37, %v3962_v29  ;;  %v1843_v36 = vmul.f32 %v1743_v19, %v3954_v26  ;;  %v1728_v29 = vld [vmem:[%s4346_s4 + $0x180] sm:$0xff] }
 0x21f   :  { %v4121_v59 = vpop.f32.mrf.mxu0  ;;  %v4123_v25 = vpop.f32.mrf.mxu1  ;;  %2023 = vmatpush1.msra.mxu1 %v1902_v35  ;;  %v1852_v35 = vmul.f32 %v1752_v11, %v3958_v27  ;;  %v1842_v34 = vmul.f32 %v1742_v33, %v3950_v22  ;;  %v1727_v27 = vld [vmem:[%s4346_s4 + $0x178] sm:$0xff]  ;;  %v1722_v22 = vld [vmem:[%s4346_s4 + $0x150] sm:$0xff]  ;;  %v1827_v3 = vunpack.c.h.bf16 %v1728_v29 }
 0x220   :  { %2024 = vmatprep.subr.mxu1 %v1893_v16  ;;  %v1824_v2 = vunpack.c.l.bf16 %v1727_v27  ;;  %v1718_v11 = vld [vmem:[%s4346_s4 + $0x130] sm:$0xff]  ;;  %v1814_v19 = vunpack.c.l.bf16 %v1722_v22 }
 0x221   :  { %v4130_v47 = vpop.f32.mrf.mxu0  ;;  %v4132_v8 = vpop.f32.mrf.mxu1  ;;  %2025 = vmatpush1.msra.mxu1 %v1892_v17  ;;  %v1833_v17 = vmul.f32 %v1733_v40, %v3946_v14  ;;  %v1723_v14 = vld [vmem:[%s4346_s4 + $0x158] sm:$0xff]  ;;  %v1712_v40 = vld [vmem:[%s4346_s4 + $0x100] sm:$0xff] }
 0x222   :  { %2026 = vmatprep.subr.mxu1 %v1883_v0  ;;  %v1825_v0 = vunpack.c.h.bf16 %v1727_v27  ;;  %v1817_v44 = vunpack.c.h.bf16 %v1723_v14  ;;  %v1806_v27 = vunpack.c.l.bf16 %v1718_v11 }
 0x223   :  { %v4139_v18 = vpop.f32.mrf.mxu0  ;;  %v4141_v32 = vpop.f32.mrf.mxu1  ;;  %2027 = vmatpush1.msra.mxu1 %v1882_v48 }
 0x224   :  { %2028 = vmatprep.subr.mxu1 %v1873_v10  ;;  %v1826_v10 = vunpack.c.l.bf16 %v1728_v29 }
 0x225   :  { %v4148_v15 = vpop.f32.mrf.mxu0  ;;  %v4150_v20 = vpop.f32.mrf.mxu1  ;;  %2029 = vmatpush1.msra.mxu1 %v1872_v31  ;;  %v1815_v31 = vunpack.c.h.bf16 %v1722_v22  ;;  %v1707_v22 = vld [vmem:[%s4346_s4 + $0xd8] sm:$0xff] }
 0x226   :  { %2030 = vmatprep.subr.mxu1 %v1863_v6  ;;  %v1816_v6 = vunpack.c.l.bf16 %v1723_v14  ;;  %v1708_v14 = vld [vmem:[%s4346_s4 + $0xe0] sm:$0xff] }
 0x227   :  { %v4154_v51 = vpop.f32.mrf.mxu0  ;;  %v4156_v28 = vpop.f32.mrf.mxu1  ;;  %2031 = vmatpush1.msra.mxu1 %v1862_v42 }
 0x228   :  { %2032 = vmatprep.subr.mxu1 %v1853_v57  ;;  %v1713_v57 = vld [vmem:[%s4346_s4 + $0x108] sm:$0xff] }
 0x229   :  { %v1505_v16 = vpop.f32.mrf.mxu0  ;;  %v1588_v58 = vpop.f32.mrf.mxu1  ;;  %2033 = vmatpush1.msra.mxu1 %v1852_v35  ;;  %v1807_v35 = vunpack.c.h.bf16 %v1718_v11 }
 0x22a   :  { %2034 = vmatprep.subr.mxu1 %v1843_v36  ;;  %v1916_v11 = vmul.f32 %v1816_v6, %v1588_v58  ;;  %v1786_v58 = vunpack.c.l.bf16 %v1708_v14 }
 0x22b   :  { %v1507_v26 = vpop.f32.mrf.mxu0  ;;  %v1590_v63 = vpop.f32.mrf.mxu1  ;;  %2035 = vmatpush1.msra.mxu1 %v1842_v34 }
 0x22c   :  { %2036 = vmatprep.subr.mxu1 %v1833_v17  ;;  %v1804_v17 = vunpack.c.l.bf16 %v1717_v43  ;;  %v1915_v55 = vmul.f32 %v1815_v31, %v1507_v26  ;;  %v1917_v21 = vmul.f32 %v1817_v44, %v1590_v63  ;;  %v1914_v43 = vmul.f32 %v1814_v19, %v1505_v16  ;;  %v1697_v19 = vld [vmem:[%s4346_s4 + $0x88] sm:$0xff] }
 0x22d   :  { %v1509_v48 = vpop.f32.mrf.mxu0  ;;  %v1592_v37 = vpop.f32.mrf.mxu1  ;;  %2037 = vmatpush1.msra.mxu1 %v1832_v50  ;;  %v1905_v26 = vmul.f32 %v1805_v23, %v4154_v51  ;;  %v1907_v63 = vmul.f32 %v1807_v35, %v4156_v28  ;;  %v1784_v16 = vunpack.c.l.bf16 %v1707_v22  ;;  %v1906_v44 = vmul.f32 %v1806_v27, %v4150_v20  ;;  %v1698_v51 = vld [vmem:[%s4346_s4 + $0x90] sm:$0xff] }
 0x22e   :  { %3032 = vmatmul.mubr.msk.f32.vlgmr.msra.gmra.mxu1 %vm1931_vm2, %v4084_v53  ;;  %v1924_v29 = vmul.f32 %v1824_v2, %v1509_v48  ;;  %v1926_v50 = vmul.f32 %v1826_v10, %v1592_v37  ;;  %v1797_v53 = vunpack.c.h.bf16 %v1713_v57  ;;  %v1702_v48 = vld [vmem:[%s4346_s4 + $0xb0] sm:$0xff]  ;;  %v1703_v2 = vld [vmem:[%s4346_s4 + $0xb8] sm:$0xff]  ;;  %v1785_v37 = vunpack.c.h.bf16 %v1707_v22 }
 0x22f   :  { %v1511_v33 = vpop.f32.mrf.mxu0  ;;  %v1594_v42 = vpop.f32.mrf.mxu1  ;;  %2141 = vmatprep.mubr.f32.mxu1 %v4351_v4  ;;  %v1795_v4 = vunpack.c.h.bf16 %v1712_v40  ;;  %v1787_v10 = vunpack.c.h.bf16 %v1708_v14  ;;  %v1904_v31 = vmul.f32 %v1804_v17, %v4148_v15  ;;  %v1775_v6 = vunpack.c.h.bf16 %v1702_v48  ;;  %v1687_v17 = vld [vmem:[%s4346_s4 + $0x38] sm:$0xff] }
 0x230   :  { %v1925_v36 = vmul.f32 %v1825_v0, %v1511_v33  ;;  %v1927_v34 = vmul.f32 %v1827_v3, %v1594_v42  ;;  %v1794_v0 = vunpack.c.l.bf16 %v1712_v40  ;;  %v1796_v3 = vunpack.c.l.bf16 %v1713_v57  ;;  %v1692_v57 = vld [vmem:[%s4346_s4 + $0x60] sm:$0xff] }
 0x231   :  { %v1777_v28 = vunpack.c.h.bf16 %v1703_v2  ;;  %v1774_v15 = vunpack.c.l.bf16 %v1702_v48  ;;  %v1776_v20 = vunpack.c.l.bf16 %v1703_v2  ;;  %v1887_v23 = vmul.f32 %v1787_v10, %v4123_v25 }
 0x232   :  { %2089 = vmatprep.subr.mxu1 %v1925_v36  ;;  %2160 = vmatprep.subr.mxu0 %v1927_v34  ;;  %v1894_v42 = vmul.f32 %v1794_v0, %v4130_v47  ;;  %v1896_v40 = vmul.f32 %v1796_v3, %v4132_v8  ;;  %v1764_v47 = vunpack.c.l.bf16 %v1697_v19  ;;  %v1766_v8 = vunpack.c.l.bf16 %v1698_v51  ;;  %v1682_v3 = vld [vmem:[%s4346_s4 + $0x10] sm:$0xff] }
 0x233   :  { %2090 = vmatpush1.msra.mxu1 %v1924_v29  ;;  %2161 = vmatpush1.msra.mxu0 %v1926_v50  ;;  %v1884_v36 = vmul.f32 %v1784_v16, %v4112_v30  ;;  %v1886_v34 = vmul.f32 %v1786_v58, %v4114_v54  ;;  %v1755_v25 = vunpack.c.h.bf16 %v1692_v57  ;;  %v1875_v29 = vmul.f32 %v1775_v6, %v4102_v41  ;;  %v1683_v41 = vld [vmem:[%s4346_s4 + $0x18] sm:$0xff] }
 0x234   :  { %2091 = vmatprep.subr.mxu1 %v1915_v55  ;;  %2162 = vmatprep.subr.mxu0 %v1917_v21  ;;  %v1895_v21 = vmul.f32 %v1795_v4, %v4139_v18  ;;  %v1897_v55 = vmul.f32 %v1797_v53, %v4141_v32  ;;  %v1693_v4 = vld [vmem:[%s4346_s4 + $0x68] sm:$0xff]  ;;  %v1765_v53 = vunpack.c.h.bf16 %v1697_v19  ;;  %v1767_v18 = vunpack.c.h.bf16 %v1698_v51 }
 0x235   :  { %2092 = vmatpush1.msra.mxu1 %v1914_v43  ;;  %2163 = vmatpush1.msra.mxu0 %v1916_v11  ;;  %v1885_v32 = vmul.f32 %v1785_v37, %v4121_v59  ;;  %v1688_v59 = vld [vmem:[%s4346_s4 + $0x40] sm:$0xff]  ;;  %v1757_v27 = vunpack.c.h.bf16 %v1693_v4  ;;  %v1877_v50 = vmul.f32 %v1777_v28, %v4104_v38  ;;  %v1754_v30 = vunpack.c.l.bf16 %v1692_v57  ;;  %v2319_v57 = vld [vmem:[#allocation5 + $0xe8] sm:$0xff] }
 0x236   :  { %v4213_v33 = vpop.f32.mrf.mxu0  ;;  %2093 = vmatprep.subr.mxu1 %v1905_v26  ;;  %2164 = vmatprep.subr.mxu0 %v1907_v63  ;;  %v1756_v54 = vunpack.c.l.bf16 %v1693_v4  ;;  %v1874_v14 = vmul.f32 %v1774_v15, %v4091_v12  ;;  %v1876_v0 = vmul.f32 %v1776_v20, %v4093_v39  ;;  %v1745_v38 = vunpack.c.h.bf16 %v1687_v17  ;;  %v4358_v28 = vld [vmem:[#allocation12_spill] sm:$0xff] }
 0x237   :  { %2094 = vmatpush1.msra.mxu1 %v1904_v31  ;;  %2165 = vmatpush1.msra.mxu0 %v1906_v44  ;;  %v1747_v43 = vunpack.c.h.bf16 %v1688_v59  ;;  %v1865_v11 = vmul.f32 %v1765_v53, %v4077_v5  ;;  %v1867_v48 = vmul.f32 %v1767_v18, %v4079_v9  ;;  %v1744_v12 = vunpack.c.l.bf16 %v1687_v17  ;;  %v2320_v15 = vld [vmem:[#allocation5 + $0xf0] sm:$0xff]  ;;  %v2303_v4 = vld [vmem:[#allocation5 + $0x68] sm:$0xff]  ;;  %v2318_v18 = vld [vmem:[#allocation5 + $0xe0] sm:$0xff] }
 0x238   :  { %v4225_v35 = vpop.f32.mrf.mxu0  ;;  %2095 = vmatprep.subr.mxu1 %v1895_v21  ;;  %2166 = vmatprep.subr.mxu0 %v1897_v55  ;;  %v1746_v39 = vunpack.c.l.bf16 %v1688_v59  ;;  %v1864_v37 = vmul.f32 %v1764_v47, %v4068_v60  ;;  %v1866_v10 = vmul.f32 %v1766_v8, %v4070_v49  ;;  %v1735_v26 = vunpack.c.h.bf16 %v1682_v3  ;;  %v2317_v47 = vld [vmem:[#allocation5 + $0xd8] sm:$0xff]  ;;  %v2300_v17 = vld [vmem:[#allocation5 + $0x50] sm:$0xff] }
 0x239   :  { %2096 = vmatpush1.msra.mxu1 %v1894_v42  ;;  %2167 = vmatpush1.msra.mxu0 %v1896_v40  ;;  %v1737_v63 = vunpack.c.h.bf16 %v1683_v41  ;;  %v1855_v16 = vmul.f32 %v1755_v25, %v4059_v24  ;;  %v1857_v5 = vmul.f32 %v1757_v27, %v4061_v52  ;;  %v1734_v9 = vunpack.c.l.bf16 %v1682_v3  ;;  %v2304_v42 = vld [vmem:[#allocation5 + $0x70] sm:$0xff]  ;;  %v2301_v8 = vld [vmem:[#allocation5 + $0x58] sm:$0xff]  ;;  %v2315_v25 = vld [vmem:[#allocation5 + $0xc8] sm:$0xff] }
 0x23a   :  { %v4237_v22 = vpop.f32.mrf.mxu0  ;;  %2097 = vmatprep.subr.mxu1 %v1885_v32  ;;  %2168 = vmatprep.subr.mxu0 %v1887_v23  ;;  %v1736_v31 = vunpack.c.l.bf16 %v1683_v41  ;;  %v1854_v44 = vmul.f32 %v1754_v30, %v4050_v45  ;;  %v1856_v60 = vmul.f32 %v1756_v54, %v4052_v1  ;;  %v1845_v49 = vmul.f32 %v1745_v38, %v4041_v46  ;;  %v4357_v46 = vld [vmem:[#allocation11_spill] sm:$0xff]  ;;  %v2312_v41 = vld [vmem:[#allocation5 + $0xb0] sm:$0xff]  ;;  %v1729_v38 = vld [vmem:[%s4346_s4 + $0x188] sm:$0xff] }
 0x23b   :  { %2098 = vmatpush1.msra.mxu1 %v1884_v36  ;;  %2169 = vmatpush1.msra.mxu0 %v1886_v34  ;;  %v1847_v19 = vmul.f32 %v1747_v43, %v4043_v13  ;;  %v1844_v24 = vmul.f32 %v1744_v12, %v4032_v7  ;;  %v1846_v52 = vmul.f32 %v1746_v39, %v4034_v56  ;;  %v2321_v7 = vld [vmem:[#allocation5 + $0xf8] sm:$0xff]  ;;  %v4360_v20 = vmov 0.0   ;;  %v2302_v32 = vld [vmem:[#allocation5 + $0x60] sm:$0xff]  ;;  %v2316_v34 = vld [vmem:[#allocation5 + $0xd0] sm:$0xff] }
 0x23c   :  { %v4249_v2 = vpop.f32.mrf.mxu0  ;;  %2099 = vmatprep.subr.mxu1 %v1875_v29  ;;  %2170 = vmatprep.subr.mxu0 %v1877_v50  ;;  %v1835_v45 = vmul.f32 %v1735_v26, %v4025_v61  ;;  %v1837_v1 = vmul.f32 %v1737_v63, %v4027_v62  ;;  %v1834_v13 = vmul.f32 %v1734_v9, %v4357_v46  ;;  %v2305_v61 = vld [vmem:[#allocation5 + $0x78] sm:$0xff]  ;;  %v2299_v27 = vld [vmem:[#allocation5 + $0x48] sm:$0xff]  ;;  %v2314_v50 = vld [vmem:[#allocation5 + $0xc0] sm:$0xff]  ;;  %v1829_v39 = vunpack.c.h.bf16 %v1729_v38 }
 0x23d   :  { %2100 = vmatpush1.msra.mxu1 %v1874_v14  ;;  %2171 = vmatpush1.msra.mxu0 %v1876_v0  ;;  %v1836_v21 = vmul.f32 %v1736_v31, %v4358_v28  ;;  %v4359_v62 = vld [vmem:[#allocation13_spill] sm:$0xff]  ;;  %v2298_v30 = vld [vmem:[#allocation5 + $0x40] sm:$0xff]  ;;  %v1828_v26 = vunpack.c.l.bf16 %v1729_v38 }
 0x23e   :  { %v4255_v58 = vpop.f32.mrf.mxu0  ;;  %2101 = vmatprep.subr.mxu1 %v1865_v11  ;;  %2172 = vmatprep.subr.mxu0 %v1867_v48  ;;  %v2313_v14 = vld [vmem:[#allocation5 + $0xb8] sm:$0xff]  ;;  %v2296_v43 = vld [vmem:[#allocation5 + $0x30] sm:$0xff]  ;;  %v2311_v48 = vld [vmem:[#allocation5 + $0xa8] sm:$0xff] }
 0x23f   :  { %2102 = vmatpush1.msra.mxu1 %v1864_v37  ;;  %2173 = vmatpush1.msra.mxu0 %v1866_v10  ;;  %v2297_v0 = vld [vmem:[#allocation5 + $0x38] sm:$0xff]  ;;  %v1724_v12 = vld [vmem:[%s4346_s4 + $0x160] sm:$0xff]  ;;  %v2295_v37 = vld [vmem:[#allocation5 + $0x28] sm:$0xff] }
 0x240   :  { %v4261_v51 = vpop.f32.mrf.mxu0  ;;  %2103 = vmatprep.subr.mxu1 %v1855_v16  ;;  %2174 = vmatprep.subr.mxu0 %v1857_v5  ;;  %v2310_v63 = vld [vmem:[#allocation5 + $0xa0] sm:$0xff]  ;;  %v1719_v16 = vld [vmem:[%s4346_s4 + $0x138] sm:$0xff]  ;;  %v1819_v5 = vunpack.c.h.bf16 %v1724_v12  ;;  %v1818_v31 = vunpack.c.l.bf16 %v1724_v12  ;;  %v2308_v46 = vld [vmem:[#allocation5 + $0x90] sm:$0xff] }
 0x241   :  { %2104 = vmatpush1.msra.mxu1 %v1854_v44  ;;  %2175 = vmatpush1.msra.mxu0 %v1856_v60  ;;  %v2294_v9 = vld [vmem:[#allocation5 + $0x20] sm:$0xff]  ;;  %v2309_v60 = vld [vmem:[#allocation5 + $0x98] sm:$0xff] }
 0x242   :  { %v4267_v6 = vpop.f32.mrf.mxu0  ;;  %2105 = vmatprep.subr.mxu1 %v1845_v49  ;;  %2176 = vmatprep.subr.mxu0 %v1847_v19  ;;  %v1714_v49 = vld [vmem:[%s4346_s4 + $0x110] sm:$0xff]  ;;  %v1809_v19 = vunpack.c.h.bf16 %v1719_v16 }
 0x243   :  { %2106 = vmatpush1.msra.mxu1 %v1844_v24  ;;  %2177 = vmatpush1.msra.mxu0 %v1846_v52  ;;  %v2293_v52 = vld [vmem:[#allocation5 + $0x18] sm:$0xff]  ;;  %v1799_v28 = vunpack.c.h.bf16 %v1714_v49 }
 0x244   :  { %v4271_v55 = vpop.f32.mrf.mxu0  ;;  %2107 = vmatprep.subr.mxu1 %v1835_v45  ;;  %2178 = vmatprep.subr.mxu0 %v1837_v1  ;;  %v1808_v45 = vunpack.c.l.bf16 %v1719_v16  ;;  %v2353_v16 = vld [vmem:[#allocation5 + $0x1f8] sm:$0xff] }
 0x245   :  { %2108 = vmatpush1.msra.mxu1 %v1834_v13  ;;  %2179 = vmatpush1.msra.mxu0 %v1836_v21  ;;  %v1709_v13 = vld [vmem:[%s4346_s4 + $0xe8] sm:$0xff] }
 0x246   :  { %v4273_v56 = vpop.f32.mrf.mxu0  ;;  %3033 = vmatmul.mubr.msk.f32.vlgmr.msra.gmra.mxu1 %vm1931_vm2, %v4359_v62  ;;  %3034 = vmatmul.mubr.msk.f32.vlgmr.msra.gmra.mxu0 %vm1931_vm2, %v4359_v62 }
 0x247   :  { %2283 = vmatprep.mubr.f32.mxu1 %v4360_v20  ;;  %3037 = vmatprep.subr.mxu0 %v2321_v7  ;;  %v2292_v7 = vld [vmem:[#allocation5 + $0x10] sm:$0xff]  ;;  %v2307_v20 = vld [vmem:[#allocation5 + $0x88] sm:$0xff] }
 0x248   :  { %v4280_v40 = vpop.f32.mrf.mxu0  ;;  %3038 = vmatpush3.msra.mxu0 %v2305_v61  ;;  %v1798_v61 = vunpack.c.l.bf16 %v1714_v49  ;;  %v2331_v49 = vld [vmem:[#allocation5 + $0x148] sm:$0xff] }
 0x249   :  { %3039 = vmatprep.subr.mxu0 %v2320_v15 }
 0x24a   :  { %v4282_v53 = vpop.f32.mrf.mxu0  ;;  %3040 = vmatpush3.msra.mxu0 %v2304_v42  ;;  %v1704_v42 = vld [vmem:[%s4346_s4 + $0xc0] sm:$0xff] }
 0x24b   :  { %3041 = vmatprep.subr.mxu0 %v2319_v57  ;;  %v1789_v57 = vunpack.c.h.bf16 %v1709_v13 }
 0x24c   :  { %v4284_v23 = vpop.f32.mrf.mxu0  ;;  %3042 = vmatpush3.msra.mxu0 %v2303_v4 }
 0x24d   :  { %3043 = vmatprep.subr.mxu0 %v2318_v18  ;;  %v2291_v18 = vld [vmem:[#allocation5 + $0x8] sm:$0xff] }
 0x24e   :  { %v4286_v36 = vpop.f32.mrf.mxu0  ;;  %3044 = vmatpush3.msra.mxu0 %v2302_v32  ;;  %v1788_v32 = vunpack.c.l.bf16 %v1709_v13  ;;  %v2343_v13 = vld [vmem:[#allocation5 + $0x1a8] sm:$0xff] }
 0x24f   :  { %3045 = vmatprep.subr.mxu0 %v2317_v47 }
 0x250   :  { %v4288_v59 = vpop.f32.mrf.mxu0  ;;  %3046 = vmatpush3.msra.mxu0 %v2301_v8  ;;  %v2306_v8 = vld [vmem:[#allocation5 + $0x80] sm:$0xff] }
 0x251   :  { %3047 = vmatprep.subr.mxu0 %v2316_v34  ;;  %v1699_v34 = vld [vmem:[%s4346_s4 + $0x98] sm:$0xff] }
 0x252   :  { %v1665_v29 = vpop.f32.mrf.mxu0  ;;  %3048 = vmatpush3.msra.mxu0 %v2300_v17  ;;  %v1779_v17 = vunpack.c.h.bf16 %v1704_v42 }
 0x253   :  { %3049 = vmatprep.subr.mxu0 %v2315_v25  ;;  %v1908_v47 = vmul.f32 %v1808_v45, %v1665_v29  ;;  %v1899_v25 = vmul.f32 %v1799_v28, %v4288_v59  ;;  %v1694_v29 = vld [vmem:[%s4346_s4 + $0x70] sm:$0xff]  ;;  %v1888_v59 = vmul.f32 %v1788_v32, %v4282_v53  ;;  %v2329_v45 = vld [vmem:[#allocation5 + $0x138] sm:$0xff]  ;;  %v2327_v28 = vld [vmem:[#allocation5 + $0x128] sm:$0xff] }
 0x254   :  { %v1667_v54 = vpop.f32.mrf.mxu0  ;;  %3050 = vmatpush3.msra.mxu0 %v2299_v27  ;;  %v2290_v27 = vld [vmem:[#allocation5] sm:$0xff]  ;;  %v1879_v38 = vmul.f32 %v1779_v17, %v4280_v40  ;;  %v2369_v17 = vld [vmem:[#allocation5 + $0x278] sm:$0xff] }
 0x255   :  { %3051 = vmatprep.subr.mxu0 %v2314_v50  ;;  %v1909_v4 = vmul.f32 %v1809_v19, %v1667_v54  ;;  %v1778_v50 = vunpack.c.l.bf16 %v1704_v42  ;;  %v2385_v54 = vld [vmem:[#allocation5 + $0x2f8] sm:$0xff]  ;;  %v2346_v19 = vld [vmem:[#allocation5 + $0x1c0] sm:$0xff]  ;;  %v2324_v42 = vld [vmem:[#allocation5 + $0x110] sm:$0xff] }
 0x256   :  { %v1671_v3 = vpop.f32.mrf.mxu0  ;;  %3052 = vmatpush3.msra.mxu0 %v2298_v30  ;;  %v1898_v30 = vmul.f32 %v1798_v61, %v4286_v36  ;;  %v1689_v36 = vld [vmem:[%s4346_s4 + $0x48] sm:$0xff]  ;;  %v2322_v32 = vld [vmem:[#allocation5 + $0x100] sm:$0xff] }
 0x257   :  { %3053 = vmatprep.subr.mxu0 %v2313_v14  ;;  %v1918_v15 = vmul.f32 %v1818_v31, %v1671_v3  ;;  %v1769_v14 = vunpack.c.h.bf16 %v1699_v34  ;;  %v1768_v3 = vunpack.c.l.bf16 %v1699_v34  ;;  %v1749_v53 = vunpack.c.h.bf16 %v1689_v36  ;;  %v2333_v31 = vld [vmem:[#allocation5 + $0x158] sm:$0xff] }
 0x258   :  { %v1673_v11 = vpop.f32.mrf.mxu0  ;;  %3054 = vmatpush3.msra.mxu0 %v2297_v0  ;;  %v1889_v0 = vmul.f32 %v1789_v57, %v4284_v23  ;;  %v1684_v23 = vld [vmem:[%s4346_s4 + $0x20] sm:$0xff]  ;;  %v1748_v12 = vunpack.c.l.bf16 %v1689_v36  ;;  %v2341_v61 = vld [vmem:[#allocation5 + $0x198] sm:$0xff]  ;;  %v2339_v57 = vld [vmem:[#allocation5 + $0x188] sm:$0xff] }
 0x259   :  { %3055 = vmatprep.subr.mxu0 %v2312_v41  ;;  %v1919_v21 = vmul.f32 %v1819_v5, %v1673_v11  ;;  %v1759_v41 = vunpack.c.h.bf16 %v1694_v29  ;;  %v1878_v11 = vmul.f32 %v1778_v50, %v4273_v56  ;;  %v2352_v5 = vld [vmem:[#allocation5 + $0x1f0] sm:$0xff]  ;;  %v2383_v50 = vld [vmem:[#allocation5 + $0x2e8] sm:$0xff] }
 0x25a   :  { %v1675_v10 = vpop.f32.mrf.mxu0  ;;  %3056 = vmatpush3.msra.mxu0 %v2296_v43  ;;  %v1758_v43 = vunpack.c.l.bf16 %v1694_v29  ;;  %v2366_v29 = vld [vmem:[#allocation5 + $0x260] sm:$0xff]  ;;  %v2379_v36 = vld [vmem:[#allocation5 + $0x2c8] sm:$0xff] }
 0x25b   :  { %3057 = vmatprep.subr.mxu0 %v2311_v48  ;;  %v1928_v1 = vmul.f32 %v1828_v26, %v1675_v10  ;;  %v1869_v48 = vmul.f32 %v1769_v14, %v4271_v55  ;;  %v1859_v40 = vmul.f32 %v1759_v41, %v4261_v51  ;;  %v1738_v10 = vunpack.c.l.bf16 %v1684_v23  ;;  %v2337_v51 = vld [vmem:[#allocation5 + $0x178] sm:$0xff]  ;;  %v2363_v41 = vld [vmem:[#allocation5 + $0x248] sm:$0xff] }
 0x25c   :  { %v1677_v44 = vpop.f32.mrf.mxu0  ;;  %3058 = vmatpush3.msra.mxu0 %v2295_v37  ;;  %v1739_v37 = vunpack.c.h.bf16 %v1684_v23  ;;  %v1858_v56 = vmul.f32 %v1758_v43, %v4255_v58  ;;  %v1849_v26 = vmul.f32 %v1749_v53, %v4249_v2  ;;  %v2336_v2 = vld [vmem:[#allocation5 + $0x170] sm:$0xff]  ;;  %v2351_v58 = vld [vmem:[#allocation5 + $0x1e8] sm:$0xff]  ;;  %v2381_v14 = vld [vmem:[#allocation5 + $0x2d8] sm:$0xff] }
 0x25d   :  { %v1929_v24 = vmul.f32 %v1829_v39, %v1677_v44  ;;  %3059 = vmatprep.subr.mxu0 %v2310_v63  ;;  %v1868_v39 = vmul.f32 %v1768_v3, %v4267_v6  ;;  %v1848_v63 = vmul.f32 %v1748_v12, %v4237_v22  ;;  %v1838_v6 = vmul.f32 %v1738_v10, %v4213_v33  ;;  %v2335_v22 = vld [vmem:[#allocation5 + $0x168] sm:$0xff]  ;;  %v2349_v33 = vld [vmem:[#allocation5 + $0x1d8] sm:$0xff]  ;;  %v2348_v44 = vld [vmem:[#allocation5 + $0x1d0] sm:$0xff] }
 0x25e   :  { %3060 = vmatpush3.msra.mxu0 %v2294_v9  ;;  %v1839_v55 = vmul.f32 %v1739_v37, %v4225_v35  ;;  %v2350_v35 = vld [vmem:[#allocation5 + $0x1e0] sm:$0xff]  ;;  %v2380_v3 = vld [vmem:[#allocation5 + $0x2d0] sm:$0xff]  ;;  %v2361_v23 = vld [vmem:[#allocation5 + $0x238] sm:$0xff] }
 0x25f   :  { %2231 = vmatprep.subr.mxu1 %v1929_v24  ;;  %3061 = vmatprep.subr.mxu0 %v2309_v60  ;;  %v2334_v9 = vld [vmem:[#allocation5 + $0x160] sm:$0xff]  ;;  %v2332_v60 = vld [vmem:[#allocation5 + $0x150] sm:$0xff]  ;;  %v2359_v10 = vld [vmem:[#allocation5 + $0x228] sm:$0xff] }
 0x260   :  { %2232 = vmatpush1.msra.mxu1 %v1928_v1  ;;  %3062 = vmatpush3.msra.mxu0 %v2293_v52  ;;  %v2330_v24 = vld [vmem:[#allocation5 + $0x140] sm:$0xff]  ;;  %v2345_v52 = vld [vmem:[#allocation5 + $0x1b8] sm:$0xff]  ;;  %v2344_v1 = vld [vmem:[#allocation5 + $0x1b0] sm:$0xff] }
 0x261   :  { %2233 = vmatprep.subr.mxu1 %v1919_v21  ;;  %3063 = vmatprep.subr.mxu0 %v2308_v46  ;;  %v2328_v46 = vld [vmem:[#allocation5 + $0x130] sm:$0xff]  ;;  %v2342_v21 = vld [vmem:[#allocation5 + $0x1a0] sm:$0xff] }
 0x262   :  { %2234 = vmatpush1.msra.mxu1 %v1918_v15  ;;  %3064 = vmatpush3.msra.mxu0 %v2292_v7  ;;  %v2326_v7 = vld [vmem:[#allocation5 + $0x120] sm:$0xff]  ;;  %v2325_v15 = vld [vmem:[#allocation5 + $0x118] sm:$0xff]  ;;  %v2376_v53 = vld [vmem:[#allocation5 + $0x2b0] sm:$0xff] }
 0x263   :  { %2235 = vmatprep.subr.mxu1 %v1909_v4  ;;  %3065 = vmatprep.subr.mxu0 %v2307_v20  ;;  %v2340_v20 = vld [vmem:[#allocation5 + $0x190] sm:$0xff]  ;;  %v2323_v4 = vld [vmem:[#allocation5 + $0x108] sm:$0xff]  ;;  %v2362_v43 = vld [vmem:[#allocation5 + $0x240] sm:$0xff] }
 0x264   :  { %2236 = vmatpush1.msra.mxu1 %v1908_v47  ;;  %3066 = vmatpush3.msra.mxu0 %v2291_v18  ;;  %v2338_v18 = vld [vmem:[#allocation5 + $0x180] sm:$0xff]  ;;  %v2417_v47 = vld [vmem:[#allocation5 + $0x3f8] sm:$0xff]  ;;  %v2360_v12 = vld [vmem:[#allocation5 + $0x230] sm:$0xff] }
 0x265   :  { %2237 = vmatprep.subr.mxu1 %v1899_v25  ;;  %3067 = vmatprep.subr.mxu0 %v2306_v8  ;;  %v2384_v25 = vld [vmem:[#allocation5 + $0x2f0] sm:$0xff] }
 0x266   :  { %2238 = vmatpush1.msra.mxu1 %v1898_v30  ;;  %3068 = vmatpush3.msra.mxu0 %v2290_v27  ;;  %v2368_v27 = vld [vmem:[#allocation5 + $0x270] sm:$0xff]  ;;  %v2367_v30 = vld [vmem:[#allocation5 + $0x268] sm:$0xff] }
 0x267   :  { %2239 = vmatprep.subr.mxu1 %v1889_v0  ;;  %3107 = vmatprep.subr.mxu0 %v2385_v54  ;;  %v2382_v54 = vld [vmem:[#allocation5 + $0x2e0] sm:$0xff]  ;;  %v2365_v0 = vld [vmem:[#allocation5 + $0x258] sm:$0xff] }
 0x268   :  { %2240 = vmatpush1.msra.mxu1 %v1888_v59  ;;  %v2364_v59 = vld [vmem:[#allocation5 + $0x250] sm:$0xff] }
 0x269   :  { %2241 = vmatprep.subr.mxu1 %v1879_v38  ;;  %v2378_v38 = vld [vmem:[#allocation5 + $0x2c0] sm:$0xff] }
 0x26a   :  { %2242 = vmatpush1.msra.mxu1 %v1878_v11  ;;  %v2377_v11 = vld [vmem:[#allocation5 + $0x2b8] sm:$0xff] }
 0x26b   :  { %2243 = vmatprep.subr.mxu1 %v1869_v48 }
 0x26c   :  { %2244 = vmatpush1.msra.mxu1 %v1868_v39  ;;  %v2375_v39 = vld [vmem:[#allocation5 + $0x2a8] sm:$0xff] }
 0x26d   :  { %2245 = vmatprep.subr.mxu1 %v1859_v40  ;;  %v2401_v40 = vld [vmem:[#allocation5 + $0x378] sm:$0xff] }
 0x26e   :  { %2246 = vmatpush1.msra.mxu1 %v1858_v56  ;;  %v2416_v56 = vld [vmem:[#allocation5 + $0x3f0] sm:$0xff] }
 0x26f   :  { %2247 = vmatprep.subr.mxu1 %v1849_v26  ;;  %v2374_v26 = vld [vmem:[#allocation5 + $0x2a0] sm:$0xff] }
 0x270   :  { %2248 = vmatpush1.msra.mxu1 %v1848_v63  ;;  %v2400_v63 = vld [vmem:[#allocation5 + $0x370] sm:$0xff] }
 0x271   :  { %2249 = vmatprep.subr.mxu1 %v1839_v55  ;;  %v2358_v55 = vld [vmem:[#allocation5 + $0x220] sm:$0xff] }
 0x272   :  { %2250 = vmatpush1.msra.mxu1 %v1838_v6  ;;  %v2415_v6 = vld [vmem:[#allocation5 + $0x3e8] sm:$0xff] }
 0x273   :  { %3035 = vmatmul.mubr.msk.f32.vlgmr.msra.gmra.mxu1 %vm1931_vm2, %v4359_v62  ;;  %3072 = vmatprep.subr.mxu1 %v2353_v16  ;;  %v2347_v62 = vld [vmem:[#allocation5 + $0x1c8] sm:$0xff]  ;;  %v2373_v16 = vld [vmem:[#allocation5 + $0x298] sm:$0xff] }
 0x274   :  { %3073 = vmatpush3.msra.mxu1 %v2337_v51  ;;  %v2399_v51 = vld [vmem:[#allocation5 + $0x368] sm:$0xff] }
 0x275   :  { %3074 = vmatprep.subr.mxu1 %v2352_v5  ;;  %v2357_v5 = vld [vmem:[#allocation5 + $0x218] sm:$0xff] }
 0x276   :  { %3075 = vmatpush3.msra.mxu1 %v2336_v2  ;;  %v2414_v2 = vld [vmem:[#allocation5 + $0x3e0] sm:$0xff] }
 0x277   :  { %3076 = vmatprep.subr.mxu1 %v2351_v58  ;;  %v2372_v58 = vld [vmem:[#allocation5 + $0x290] sm:$0xff] }
 0x278   :  { %3077 = vmatpush3.msra.mxu1 %v2335_v22  ;;  %v2398_v22 = vld [vmem:[#allocation5 + $0x360] sm:$0xff] }
 0x279   :  { %3078 = vmatprep.subr.mxu1 %v2350_v35  ;;  %v2356_v35 = vld [vmem:[#allocation5 + $0x210] sm:$0xff] }
 0x27a   :  { %3079 = vmatpush3.msra.mxu1 %v2334_v9  ;;  %v2413_v9 = vld [vmem:[#allocation5 + $0x3d8] sm:$0xff] }
 0x27b   :  { %3080 = vmatprep.subr.mxu1 %v2349_v33  ;;  %v2371_v33 = vld [vmem:[#allocation5 + $0x288] sm:$0xff] }
 0x27c   :  { %3081 = vmatpush3.msra.mxu1 %v2333_v31  ;;  %v2397_v31 = vld [vmem:[#allocation5 + $0x358] sm:$0xff] }
 0x27d   :  { %3082 = vmatprep.subr.mxu1 %v2348_v44  ;;  %v2355_v44 = vld [vmem:[#allocation5 + $0x208] sm:$0xff] }
 0x27e   :  { %3083 = vmatpush3.msra.mxu1 %v2332_v60  ;;  %v2412_v60 = vld [vmem:[#allocation5 + $0x3d0] sm:$0xff] }
 0x27f   :  { %3084 = vmatprep.subr.mxu1 %v2347_v62  ;;  %v2370_v62 = vld [vmem:[#allocation5 + $0x280] sm:$0xff] }
 0x280   :  { %3085 = vmatpush3.msra.mxu1 %v2331_v49  ;;  %v2396_v49 = vld [vmem:[#allocation5 + $0x350] sm:$0xff] }
 0x281   :  { %3086 = vmatprep.subr.mxu1 %v2346_v19  ;;  %v2354_v19 = vld [vmem:[#allocation5 + $0x200] sm:$0xff] }
 0x282   :  { %3087 = vmatpush3.msra.mxu1 %v2330_v24  ;;  %v2411_v24 = vld [vmem:[#allocation5 + $0x3c8] sm:$0xff] }
 0x283   :  { %3088 = vmatprep.subr.mxu1 %v2345_v52  ;;  %v2449_v52 = vld [vmem:[#allocation5 + $0x4f8] sm:$0xff] }
 0x284   :  { %3089 = vmatpush3.msra.mxu1 %v2329_v45  ;;  %v2395_v45 = vld [vmem:[#allocation5 + $0x348] sm:$0xff] }
 0x285   :  { %3090 = vmatprep.subr.mxu1 %v2344_v1  ;;  %v2410_v1 = vld [vmem:[#allocation5 + $0x3c0] sm:$0xff] }
 0x286   :  { %3091 = vmatpush3.msra.mxu1 %v2328_v46  ;;  %v2394_v46 = vld [vmem:[#allocation5 + $0x340] sm:$0xff] }
 0x287   :  { %3092 = vmatprep.subr.mxu1 %v2343_v13  ;;  %v2409_v13 = vld [vmem:[#allocation5 + $0x3b8] sm:$0xff] }
 0x288   :  { %3093 = vmatpush3.msra.mxu1 %v2327_v28  ;;  %v2393_v28 = vld [vmem:[#allocation5 + $0x338] sm:$0xff] }
 0x289   :  { %3094 = vmatprep.subr.mxu1 %v2342_v21  ;;  %v2408_v21 = vld [vmem:[#allocation5 + $0x3b0] sm:$0xff] }
 0x28a   :  { %3095 = vmatpush3.msra.mxu1 %v2326_v7  ;;  %v2392_v7 = vld [vmem:[#allocation5 + $0x330] sm:$0xff] }
 0x28b   :  { %3096 = vmatprep.subr.mxu1 %v2341_v61  ;;  %v2407_v61 = vld [vmem:[#allocation5 + $0x3a8] sm:$0xff] }
 0x28c   :  { %3097 = vmatpush3.msra.mxu1 %v2325_v15  ;;  %v2391_v15 = vld [vmem:[#allocation5 + $0x328] sm:$0xff] }
 0x28d   :  { %3098 = vmatprep.subr.mxu1 %v2340_v20  ;;  %v2406_v20 = vld [vmem:[#allocation5 + $0x3a0] sm:$0xff] }
 0x28e   :  { %3099 = vmatpush3.msra.mxu1 %v2324_v42 }
 0x28f   :  { %3100 = vmatprep.subr.mxu1 %v2339_v57  ;;  %v2390_v57 = vld [vmem:[#allocation5 + $0x320] sm:$0xff] }
 0x290   :  { %3101 = vmatpush3.msra.mxu1 %v2323_v4 }
 0x291   :  { %3102 = vmatprep.subr.mxu1 %v2338_v18  ;;  %v2405_v18 = vld [vmem:[#allocation5 + $0x398] sm:$0xff] }
 0x292   :  { %3103 = vmatpush3.msra.mxu1 %v2322_v32 }
 0x293   :  { %3142 = vmatprep.subr.mxu1 %v2417_v47  ;;  %v2389_v47 = vld [vmem:[#allocation5 + $0x318] sm:$0xff] }
 0x2da   :  { %v2001_v8 = vpop.f32.mrf.mxu1 }
 0x2dc   :  { %v2003_v34 = vpop.f32.mrf.mxu1 }
 0x2dd   :  { %2521 = vmatprep.mubr.f32.mxu0 %v2003_v34  ;;  %v2404_v34 = vld [vmem:[#allocation5 + $0x390] sm:$0xff] }
 0x2de   :  { %2522 = vmatmul.mubr.f32.vlgmr.msra.gmra.mxu0 %v2001_v8 }
 0x2df   :  { %3108 = vmatpush3.msra.mxu0 %v2369_v17  ;;  %v2433_v17 = vld [vmem:[#allocation5 + $0x478] sm:$0xff] }
 0x2e0   :  { %3109 = vmatprep.subr.mxu0 %v2384_v25  ;;  %v2388_v25 = vld [vmem:[#allocation5 + $0x310] sm:$0xff] }
 0x2e1   :  { %3110 = vmatpush3.msra.mxu0 %v2368_v27  ;;  %v2448_v27 = vld [vmem:[#allocation5 + $0x4f0] sm:$0xff] }
 0x2e2   :  { %3111 = vmatprep.subr.mxu0 %v2383_v50  ;;  %v2403_v50 = vld [vmem:[#allocation5 + $0x388] sm:$0xff] }
 0x2e3   :  { %3112 = vmatpush3.msra.mxu0 %v2367_v30  ;;  %v2432_v30 = vld [vmem:[#allocation5 + $0x470] sm:$0xff] }
 0x2e4   :  { %3113 = vmatprep.subr.mxu0 %v2382_v54  ;;  %v2387_v54 = vld [vmem:[#allocation5 + $0x308] sm:$0xff] }
 0x2e5   :  { %3114 = vmatpush3.msra.mxu0 %v2366_v29  ;;  %v2447_v29 = vld [vmem:[#allocation5 + $0x4e8] sm:$0xff] }
 0x2e6   :  { %3115 = vmatprep.subr.mxu0 %v2381_v14  ;;  %v2402_v14 = vld [vmem:[#allocation5 + $0x380] sm:$0xff] }
 0x2e7   :  { %3116 = vmatpush3.msra.mxu0 %v2365_v0  ;;  %v2431_v0 = vld [vmem:[#allocation5 + $0x468] sm:$0xff] }
 0x2e8   :  { %3117 = vmatprep.subr.mxu0 %v2380_v3  ;;  %v2386_v3 = vld [vmem:[#allocation5 + $0x300] sm:$0xff] }
 0x2e9   :  { %3118 = vmatpush3.msra.mxu0 %v2364_v59  ;;  %v2446_v59 = vld [vmem:[#allocation5 + $0x4e0] sm:$0xff] }
 0x2ea   :  { %3119 = vmatprep.subr.mxu0 %v2379_v36  ;;  %v2430_v36 = vld [vmem:[#allocation5 + $0x460] sm:$0xff] }
 0x2eb   :  { %3120 = vmatpush3.msra.mxu0 %v2363_v41  ;;  %v2445_v41 = vld [vmem:[#allocation5 + $0x4d8] sm:$0xff] }
 0x2ec   :  { %3121 = vmatprep.subr.mxu0 %v2378_v38  ;;  %v2429_v38 = vld [vmem:[#allocation5 + $0x458] sm:$0xff] }
 0x2ed   :  { %3122 = vmatpush3.msra.mxu0 %v2362_v43  ;;  %v2444_v43 = vld [vmem:[#allocation5 + $0x4d0] sm:$0xff] }
 0x2ee   :  { %v2072_v48 = vpop.f32.mrf.mxu1  ;;  %3123 = vmatprep.subr.mxu0 %v2377_v11  ;;  %v2428_v11 = vld [vmem:[#allocation5 + $0x450] sm:$0xff] }
 0x2ef   :  { %3124 = vmatpush3.msra.mxu0 %v2361_v23  ;;  %v2443_v23 = vld [vmem:[#allocation5 + $0x4c8] sm:$0xff] }
 0x2f0   :  { %v2074_v37 = vpop.f32.mrf.mxu1  ;;  %3125 = vmatprep.subr.mxu0 %v2376_v53  ;;  %v2427_v53 = vld [vmem:[#allocation5 + $0x448] sm:$0xff] }
 0x2f1   :  { %2591 = vmatprep.mubr.f32.mxu1 %v2074_v37  ;;  %3126 = vmatpush3.msra.mxu0 %v2360_v12  ;;  %v2426_v12 = vld [vmem:[#allocation5 + $0x440] sm:$0xff]  ;;  %v2425_v37 = vld [vmem:[#allocation5 + $0x438] sm:$0xff] }
 0x2f2   :  { %2592 = vmatmul.mubr.f32.vlgmr.msra.gmra.mxu1 %v2072_v48  ;;  %3127 = vmatprep.subr.mxu0 %v2375_v39  ;;  %v2442_v48 = vld [vmem:[#allocation5 + $0x4c0] sm:$0xff]  ;;  %v2441_v39 = vld [vmem:[#allocation5 + $0x4b8] sm:$0xff] }
 0x2f3   :  { %3143 = vmatpush3.msra.mxu1 %v2401_v40  ;;  %3128 = vmatpush3.msra.mxu0 %v2359_v10  ;;  %v2440_v40 = vld [vmem:[#allocation5 + $0x4b0] sm:$0xff] }
 0x2f4   :  { %3144 = vmatprep.subr.mxu1 %v2416_v56  ;;  %3129 = vmatprep.subr.mxu0 %v2374_v26  ;;  %v2424_v10 = vld [vmem:[#allocation5 + $0x430] sm:$0xff]  ;;  %v2439_v56 = vld [vmem:[#allocation5 + $0x4a8] sm:$0xff] }
 0x2f5   :  { %3145 = vmatpush3.msra.mxu1 %v2400_v63  ;;  %3130 = vmatpush3.msra.mxu0 %v2358_v55  ;;  %v2423_v26 = vld [vmem:[#allocation5 + $0x428] sm:$0xff]  ;;  %v2438_v63 = vld [vmem:[#allocation5 + $0x4a0] sm:$0xff] }
 0x2f6   :  { %3146 = vmatprep.subr.mxu1 %v2415_v6  ;;  %3131 = vmatprep.subr.mxu0 %v2373_v16  ;;  %v2422_v55 = vld [vmem:[#allocation5 + $0x420] sm:$0xff]  ;;  %v2437_v6 = vld [vmem:[#allocation5 + $0x498] sm:$0xff] }
 0x2f7   :  { %3147 = vmatpush3.msra.mxu1 %v2399_v51  ;;  %3132 = vmatpush3.msra.mxu0 %v2357_v5  ;;  %v2421_v16 = vld [vmem:[#allocation5 + $0x418] sm:$0xff]  ;;  %v2436_v51 = vld [vmem:[#allocation5 + $0x490] sm:$0xff] }
 0x2f8   :  { %3148 = vmatprep.subr.mxu1 %v2414_v2  ;;  %3133 = vmatprep.subr.mxu0 %v2372_v58  ;;  %v2420_v5 = vld [vmem:[#allocation5 + $0x410] sm:$0xff]  ;;  %v2435_v2 = vld [vmem:[#allocation5 + $0x488] sm:$0xff] }
 0x2f9   :  { %3149 = vmatpush3.msra.mxu1 %v2398_v22  ;;  %3134 = vmatpush3.msra.mxu0 %v2356_v35  ;;  %v2419_v58 = vld [vmem:[#allocation5 + $0x408] sm:$0xff]  ;;  %v2434_v22 = vld [vmem:[#allocation5 + $0x480] sm:$0xff] }
 0x2fa   :  { %3150 = vmatprep.subr.mxu1 %v2413_v9  ;;  %3135 = vmatprep.subr.mxu0 %v2371_v33  ;;  %v2418_v35 = vld [vmem:[#allocation5 + $0x400] sm:$0xff] }
 0x2fb   :  { %3151 = vmatpush3.msra.mxu1 %v2397_v31  ;;  %3136 = vmatpush3.msra.mxu0 %v2355_v44 }
 0x2fc   :  { %3152 = vmatprep.subr.mxu1 %v2412_v60  ;;  %3137 = vmatprep.subr.mxu0 %v2370_v62 }
 0x2fd   :  { %3153 = vmatpush3.msra.mxu1 %v2396_v49  ;;  %3138 = vmatpush3.msra.mxu0 %v2354_v19 }
 0x2fe   :  { %3154 = vmatprep.subr.mxu1 %v2411_v24  ;;  %3177 = vmatprep.subr.mxu0 %v2449_v52  ;;  %v3036_v52 = vld [vmem:[%s4349_s7] ss:$0 sm:$0xff] }
 0x2ff   :  { %3155 = vmatpush3.msra.mxu1 %v2395_v45 }
 0x300   :  { %3156 = vmatprep.subr.mxu1 %v2410_v1 }
 0x301   :  { %3157 = vmatpush3.msra.mxu1 %v2394_v46 }
 0x302   :  { %3158 = vmatprep.subr.mxu1 %v2409_v13 }
 0x303   :  { %3159 = vmatpush3.msra.mxu1 %v2393_v28 }
 0x304   :  { %3160 = vmatprep.subr.mxu1 %v2408_v21 }
 0x305   :  { %3161 = vmatpush3.msra.mxu1 %v2392_v7 }
 0x306   :  { %v2143_v42 = vpop.f32.mrf.mxu1  ;;  %3162 = vmatprep.subr.mxu1 %v2407_v61  ;;  %v2214_v4 = vpop.f32.mrf.mxu0 }
 0x307   :  { %3163 = vmatpush3.msra.mxu1 %v2391_v15 }
 0x308   :  { %v2145_v32 = vpop.f32.mrf.mxu1  ;;  %3164 = vmatprep.subr.mxu1 %v2406_v20  ;;  %v2216_v8 = vpop.f32.mrf.mxu0 }
 0x309   :  { %2661 = vmatprep.mubr.f32.mxu0 %v2145_v32  ;;  %3165 = vmatpush3.msra.mxu1 %v2390_v57 }
 0x30a   :  { %2662 = vmatmul.mubr.f32.vlgmr.msra.gmra.mxu0 %v2143_v42  ;;  %3166 = vmatprep.subr.mxu1 %v2405_v18 }
 0x30b   :  { %3167 = vmatpush3.msra.mxu1 %v2389_v47  ;;  %2731 = vmatprep.mubr.f32.mxu1 %v2216_v8 }
 0x30c   :  { %3168 = vmatprep.subr.mxu1 %v2404_v34  ;;  %3178 = vmatpush3.msra.mxu0 %v2433_v17 }
 0x30d   :  { %3169 = vmatpush3.msra.mxu1 %v2388_v25  ;;  %3179 = vmatprep.subr.mxu0 %v2448_v27 }
 0x30e   :  { %3170 = vmatprep.subr.mxu1 %v2403_v50  ;;  %3180 = vmatpush3.msra.mxu0 %v2432_v30 }
 0x30f   :  { %3171 = vmatpush3.msra.mxu1 %v2387_v54  ;;  %3181 = vmatprep.subr.mxu0 %v2447_v29 }
 0x310   :  { %3172 = vmatprep.subr.mxu1 %v2402_v14  ;;  %3182 = vmatpush3.msra.mxu0 %v2431_v0 }
 0x311   :  { %3173 = vmatpush3.msra.mxu1 %v2386_v3  ;;  %3183 = vmatprep.subr.mxu0 %v2446_v59 }
 0x312   :  { %2732 = vmatmul.mubr.f32.vlgmr.msra.gmra.mxu1 %v2214_v4  ;;  %3184 = vmatpush3.msra.mxu0 %v2430_v36 }
 0x313   :  { %3185 = vmatprep.subr.mxu0 %v2445_v41 }
 0x314   :  { %3186 = vmatpush3.msra.mxu0 %v2429_v38 }
 0x315   :  { %3187 = vmatprep.subr.mxu0 %v2444_v43 }
 0x316   :  { %3188 = vmatpush3.msra.mxu0 %v2428_v11 }
 0x317   :  { %3189 = vmatprep.subr.mxu0 %v2443_v23 }
 0x318   :  { %3190 = vmatpush3.msra.mxu0 %v2427_v53 }
 0x319   :  { %3191 = vmatprep.subr.mxu0 %v2442_v48 }
 0x31a   :  { %3192 = vmatpush3.msra.mxu0 %v2426_v12 }
 0x31b   :  { %3193 = vmatprep.subr.mxu0 %v2441_v39 }
 0x31c   :  { %3194 = vmatpush3.msra.mxu0 %v2425_v37 }
 0x31d   :  { %3195 = vmatprep.subr.mxu0 %v2440_v40 }
 0x31e   :  { %3196 = vmatpush3.msra.mxu0 %v2424_v10 }
 0x31f   :  { %3197 = vmatprep.subr.mxu0 %v2439_v56 }
 0x320   :  { %3198 = vmatpush3.msra.mxu0 %v2423_v26 }
 0x321   :  { %3199 = vmatprep.subr.mxu0 %v2438_v63 }
 0x322   :  { %3200 = vmatpush3.msra.mxu0 %v2422_v55 }
 0x323   :  { %3201 = vmatprep.subr.mxu0 %v2437_v6 }
 0x324   :  { %3202 = vmatpush3.msra.mxu0 %v2421_v16 }
 0x325   :  { %3203 = vmatprep.subr.mxu0 %v2436_v51 }
 0x326   :  { %3204 = vmatpush3.msra.mxu0 %v2420_v5 }
 0x327   :  { %3205 = vmatprep.subr.mxu0 %v2435_v2 }
 0x328   :  { %3206 = vmatpush3.msra.mxu0 %v2419_v58 }
 0x329   :  { %3207 = vmatprep.subr.mxu0 %v2434_v22 }
 0x32a   :  { %3208 = vmatpush3.msra.mxu0 %v2418_v35 }
 0x333   :  { %v2285_v9 = vpop.f32.mrf.mxu1 }
 0x335   :  { %v2287_v33 = vpop.f32.mrf.mxu1 }
 0x336   :  { %2801 = vmatprep.mubr.f32.mxu0 %v2287_v33 }
 0x337   :  { %2802 = vmatmul.mubr.f32.vlgmr.msra.gmra.mxu0 %v2285_v9 }
 0x39e   :  { %v3069_v31 = vpop.f32.mrf.mxu0 }
 0x3a0   :  { %v3070_v60 = vpop.f32.mrf.mxu0 }
 0x3a1   :  { %v3071_v24 = vadd.f32 %v3070_v60, %v3069_v31 }
 0x3a3   :  { %v2524_v13 = vadd.f32 %v3071_v24, %v3036_v52 }
 0x3b2   :  { %v3104_v44 = vpop.f32.mrf.mxu1 }
 0x3b4   :  { %v3105_v62 = vpop.f32.mrf.mxu1 }
 0x3b5   :  { %v3106_v1 = vadd.f32 %v3105_v62, %v3104_v44 }
 0x3b7   :  { %v2594_v21 = vadd.f32 %v3106_v1, %v2524_v13 }
 0x3ca   :  { %v3139_v49 = vpop.f32.mrf.mxu0 }
 0x3cc   :  { %v3140_v45 = vpop.f32.mrf.mxu0 }
 0x3cd   :  { %v3141_v28 = vadd.f32 %v3140_v45, %v3139_v49 }
 0x3cf   :  { %v2664_v15 = vadd.f32 %v3141_v28, %v2594_v21 }
 0x3d2   :  { %v3174_v19 = vpop.f32.mrf.mxu1 }
 0x3d4   :  { %v3175_v46 = vpop.f32.mrf.mxu1 }
 0x3d5   :  { %v3176_v7 = vadd.f32 %v3175_v46, %v3174_v19 }
 0x3d7   :  { %v2734_v42 = vadd.f32 %v3176_v7, %v2664_v15 }
 0x3f7   :  { %v3209_v61 = vpop.f32.mrf.mxu0 }
 0x3f9   :  { %v3210_v20 = vpop.f32.mrf.mxu0 }
 0x3fa   :  { %v3211_v57 = vadd.f32 %v3210_v20, %v3209_v61 }
 0x3fc   :  { %v2804_v4 = vadd.f32 %v3211_v57, %v2734_v42 }
 0x3fe   :  { %2807 = vst [vmem:[#allocation7] sm:$0x3] %v2804_v4 }
 0x3ff   :  { %3522 = shalt.err (!%p3519_p0)
}
 0x400   :  { %2817 = dma.vmem_to_hbm [thread:$0]  %s2815_s17, 32, %s4350_s8, [#allocation4]  }
 0x401   :  { %3535 = dma.done.wait [#allocation4], 32  }
 0x402   :  { %3536 = vsyncadd [#allocation4], 4294967264 }
 0x403   :  { %2821 = vsyncpa [#allocation3], 1 }
 0x404   :  { %2822 = vsyncpa [#allocation6], 1 }
 0x405   :  { %2823 = vsyncpa [#allocation4], 1 }

</bundles_post_ra>
